<compile_context>
chip_gen: v5e
topology: v5e:2x2
jax: 0.10.0
libtpu: 0.0.40
codegen_flags: <defaults>
</compile_context>

<pallas_src>
import functools
import math

import jax
import jax.numpy as jnp
from jax import lax
from jax.experimental import pallas as pl
from jax.experimental.pallas import tpu as pltpu


# ----------------------------------------------------------------------------
# Hardware-aware budgets / tile helpers
# ----------------------------------------------------------------------------
@functools.lru_cache(maxsize=None)
def _vmem_budget_bytes():
    """~75% of physical VMEM (48 MiB on v7x, 96 MiB on v5e/v6e), safe fallback."""
    try:
        cap = getattr(pltpu.get_tpu_info(), "vmem_capacity_bytes", None) or 0
        cap = int(cap)
        if cap > 0:
            return max(32 * 1024 * 1024, (cap * 3) // 4)
    except Exception:
        pass
    return 48 * 1024 * 1024  # conservative: fits v7x's 64 MiB physical VMEM


def _pick_tile(dim, target, align):
    """Largest `align`-aligned divisor of `dim` that is <= target, else dim."""
    if dim <= target:
        return dim
    t = (target // align) * align
    while t >= align:
        if dim % t == 0:
            return t
        t -= align
    return dim


def _pick_head_block(bh, dh):
    """Batch heads per attention grid step; hb must divide bh."""
    target = max(1, 128 // max(dh, 1))
    if bh <= target:
        return bh
    for hb in range(min(target, bh), 0, -1):
        if bh % hb == 0:
            return hb
    return 1


def _default_mm_tiles():
    # Bigger output tiles amortize per-step overhead where VMEM allows it
    # (v5e/v6e, 128 MiB); stay at 256 against v7x's 64 MiB physical VMEM.
    if _vmem_budget_bytes() >= 80 * 1024 * 1024:
        return 512, 512, 512
    return 256, 256, 512


# ----------------------------------------------------------------------------
# Kernel 1: fused Q|K|V projection  -> (3, M, Dm)  (plane-separated output)
# ----------------------------------------------------------------------------
def _qkv_proj_kernel(x_ref, w_ref, b_ref, o_ref, acc_ref, *, compute_dtype):
    @pl.when(pl.program_id(3) == 0)
    def _():
        acc_ref[...] = jnp.zeros_like(acc_ref)

    acc_ref[...] += jnp.dot(
        x_ref[...].astype(compute_dtype),
        w_ref[0].astype(compute_dtype),
        preferred_element_type=jnp.float32,
    )

    @pl.when(pl.program_id(3) == pl.num_programs(3) - 1)
    def _():
        o_ref[0] = (acc_ref[...] + b_ref[0]).astype(o_ref.dtype)


def qkv_projection(x2d, w_qkv, b_qkv, *, compute_dtype):
    """x2d: (M, Dm); w_qkv: (3, Dm, Dm); b_qkv: (3, 1, Dm)  ->  (3, M, Dm)."""
    M, K = x2d.shape
    three, K2, N = w_qkv.shape
    assert three == 3 and K2 == K and N == K
    tm, tn, tk = _default_mm_tiles()
    tm = _pick_tile(M, tm, 8)
    tn = _pick_tile(N, tn, 128)
    tk = _pick_tile(K, tk, 128)
    grid = (3, M // tm, N // tn, K // tk)
    cost = pl.CostEstimate(
        flops=int(2 * 3 * M * N * K + 3 * M * N),
        transcendentals=0,
        bytes_accessed=int(4 * (M * K + 3 * K * N + 3 * M * N + 3 * N)),
    )
    kern = functools.partial(_qkv_proj_kernel, compute_dtype=compute_dtype)
    return pl.pallas_call(
        kern,
        out_shape=jax.ShapeDtypeStruct((3, M, N), jnp.float32),
        grid_spec=pltpu.PrefetchScalarGridSpec(
            num_scalar_prefetch=0,
            grid=grid,
            in_specs=[
                pl.BlockSpec((tm, tk), lambda g, i, j, k: (i, k)),
                pl.BlockSpec((1, tk, tn), lambda g, i, j, k: (g, k, j)),
                pl.BlockSpec((1, 1, tn), lambda g, i, j, k: (g, 0, j)),
            ],
            out_specs=pl.BlockSpec((1, tm, tn), lambda g, i, j, k: (g, i, j)),
            scratch_shapes=[pltpu.VMEM((tm, tn), jnp.float32)],
        ),
        compiler_params=pltpu.CompilerParams(
            dimension_semantics=("parallel", "parallel", "parallel", "arbitrary"),
            vmem_limit_bytes=_vmem_budget_bytes(),
        ),
        cost_estimate=cost,
    )(x2d, w_qkv, b_qkv)


# ----------------------------------------------------------------------------
# Kernel 2: flash (online-softmax) scaled-dot-product attention
#           grid = (head-block, q-tile, kv-tile);  kv axis is the reduction
# ----------------------------------------------------------------------------
def _flash_attn_kernel(q_ref, k_ref, v_ref, o_ref, m_ref, l_ref, acc_ref, *,
                       scale, compute_dtype):
    ki = pl.program_id(2)

    @pl.when(ki == 0)
    def _():
        m_ref[...] = jnp.full_like(m_ref, -jnp.inf)
        l_ref[...] = jnp.zeros_like(l_ref)
        acc_ref[...] = jnp.zeros_like(acc_ref)

    q = (q_ref[...] * scale).astype(compute_dtype)  # scale folded into Q
    k = k_ref[...].astype(compute_dtype)
    # Batched Q K^T contracting on Dh (no explicit transpose -> stays off XLU).
    s = lax.dot_general(
        q, k, (((2,), (2,)), ((0,), (0,))), preferred_element_type=jnp.float32
    )  # (hb, tq, tkv)

    m_prev = m_ref[...]
    m_new = jnp.maximum(m_prev, jnp.max(s, axis=-1, keepdims=True))
    alpha = jnp.exp(m_prev - m_new)
    p = jnp.exp(s - m_new)
    l_ref[...] = alpha * l_ref[...] + jnp.sum(p, axis=-1, keepdims=True)
    acc_ref[...] = alpha * acc_ref[...] + lax.dot_general(
        p.astype(compute_dtype), v_ref[...].astype(compute_dtype),
        (((2,), (1,)), ((0,), (0,))), preferred_element_type=jnp.float32,
    )
    m_ref[...] = m_new

    @pl.when(ki == pl.num_programs(2) - 1)
    def _():
        # Denominator folded into the (tq, Dh) context, not the (tq, tkv) probs.
        inv_l = pl.reciprocal(l_ref[...], approx=True)
        o_ref[...] = (acc_ref[...] * inv_l).astype(o_ref.dtype)


def scaled_dot_product_attention(q, k, v, scale, *, compute_dtype):
    # TODO(synk): for Dh < 128 the context store last-dim is lane-sparse and the
    # P@V matmul underfills the MXU width; pack hb heads into the lane dim (or
    # fuse the context write into the out-proj matmul) for a lane-dense epilogue.
    BH, S, Dh = q.shape
    hb = _pick_head_block(BH, Dh)
    tq = _pick_tile(S, 256, 8)
    tkv = _pick_tile(S, 256, 8)
    grid = (BH // hb, S // tq, S // tkv)
    cost = pl.CostEstimate(
        flops=int(4 * BH * S * S * Dh),
        transcendentals=int(BH * S * S),
        bytes_accessed=int(4 * 4 * BH * S * Dh),
    )
    kern = functools.partial(_flash_attn_kernel, scale=scale,
                             compute_dtype=compute_dtype)
    q_spec = pl.BlockSpec((hb, tq, Dh), lambda h, qi, ki: (h, qi, 0))
    kv_spec = pl.BlockSpec((hb, tkv, Dh), lambda h, qi, ki: (h, ki, 0))
    return pl.pallas_call(
        kern,
        out_shape=jax.ShapeDtypeStruct((BH, S, Dh), jnp.float32),
        grid_spec=pltpu.PrefetchScalarGridSpec(
            num_scalar_prefetch=0,
            grid=grid,
            in_specs=[q_spec, kv_spec, kv_spec],
            out_specs=pl.BlockSpec((hb, tq, Dh), lambda h, qi, ki: (h, qi, 0)),
            scratch_shapes=[
                pltpu.VMEM((hb, tq, 1), jnp.float32),   # running max m
                pltpu.VMEM((hb, tq, 1), jnp.float32),   # running denom l
                pltpu.VMEM((hb, tq, Dh), jnp.float32),  # context accumulator
            ],
        ),
        compiler_params=pltpu.CompilerParams(
            dimension_semantics=("parallel", "parallel", "arbitrary"),
            vmem_limit_bytes=_vmem_budget_bytes(),
        ),
        cost_estimate=cost,
    )(q, k, v)


# ----------------------------------------------------------------------------
# Kernel 3: output projection + residual + LayerNorm (fused), K-tiled
#           out = LN(context @ Wo + bo + x)
# ----------------------------------------------------------------------------
def _out_ln_kernel(c_ref, w_ref, b_ref, x_ref, g_ref, beta_ref, o_ref, acc_ref,
                   *, eps, compute_dtype):
    k = pl.program_id(1)

    @pl.when(k == 0)
    def _():
        acc_ref[...] = jnp.zeros_like(acc_ref)

    acc_ref[...] += jnp.dot(
        c_ref[...].astype(compute_dtype),
        w_ref[...].astype(compute_dtype),
        preferred_element_type=jnp.float32,
    )

    @pl.when(k == pl.num_programs(1) - 1)
    def _():
        h = acc_ref[...] + b_ref[...] + x_ref[...]  # bias + residual in f32
        mean = jnp.mean(h, axis=-1, keepdims=True)
        centered = h - mean
        var = jnp.mean(centered * centered, axis=-1, keepdims=True)
        normed = centered * lax.rsqrt(var + eps)    # rsqrt on the EUP
        o_ref[...] = (normed * g_ref[...] + beta_ref[...]).astype(o_ref.dtype)


def out_proj_residual_layernorm(context2d, w, b2d, x2d, gamma2d, beta2d, *,
                                eps, compute_dtype):
    # LayerNorm needs the full row, so N stays untiled; K is the reduction grid
    # axis so only a (tk, N) weight slab is ever resident in VMEM.
    M, K = context2d.shape
    K2, N = w.shape
    assert K == K2
    tm, _, tk = _default_mm_tiles()
    tm = _pick_tile(M, tm, 8)
    tk = _pick_tile(K, tk, 128)
    grid = (M // tm, K // tk)
    cost = pl.CostEstimate(
        flops=int(2 * M * N * K + 8 * M * N),
        transcendentals=int(M),
        bytes_accessed=int(4 * (M * K + K * N + 2 * M * N + 3 * N)),
    )
    kern = functools.partial(_out_ln_kernel, eps=eps, compute_dtype=compute_dtype)
    return pl.pallas_call(
        kern,
        out_shape=jax.ShapeDtypeStruct((M, N), jnp.float32),
        grid_spec=pltpu.PrefetchScalarGridSpec(
            num_scalar_prefetch=0,
            grid=grid,
            in_specs=[
                pl.BlockSpec((tm, tk), lambda i, k: (i, k)),
                pl.BlockSpec((tk, N), lambda i, k: (k, 0)),
                pl.BlockSpec((1, N), lambda i, k: (0, 0)),
                pl.BlockSpec((tm, N), lambda i, k: (i, 0)),
                pl.BlockSpec((1, N), lambda i, k: (0, 0)),
                pl.BlockSpec((1, N), lambda i, k: (0, 0)),
            ],
            out_specs=pl.BlockSpec((tm, N), lambda i, k: (i, 0)),
            scratch_shapes=[pltpu.VMEM((tm, N), jnp.float32)],
        ),
        compiler_params=pltpu.CompilerParams(
            dimension_semantics=("parallel", "arbitrary"),
            vmem_limit_bytes=_vmem_budget_bytes(),
        ),
        cost_estimate=cost,
    )(context2d, w, b2d, x2d, gamma2d, beta2d)


# ----------------------------------------------------------------------------
# Full Multi_Head_Attention forward
# ----------------------------------------------------------------------------
def multi_head_attention(x, params, num_head, *, compute_dtype=jnp.bfloat16,
                         ln_eps=1e-5):
    B, S, Dm = x.shape
    assert Dm % num_head == 0
    dim_head = Dm // num_head

    x2d = x.reshape(B * S, Dm)

    # Fused QKV projection: (3, B*S, Dm); planes are contiguous leading slices.
    qkv = qkv_projection(x2d, params["w_qkv"], params["b_qkv"],
                         compute_dtype=compute_dtype)

    # Plain contiguous reshape, exactly like torch .view(B*H, -1, Dh).
    Q = qkv[0].reshape(B * num_head, S, dim_head)
    K = qkv[1].reshape(B * num_head, S, dim_head)
    V = qkv[2].reshape(B * num_head, S, dim_head)

    scale = float(dim_head) ** (-0.5)
    context = scaled_dot_product_attention(Q, K, V, scale,
                                           compute_dtype=compute_dtype)

    # .view(B, -1, H*Dh) -> (B*S, Dm)
    context2d = context.reshape(B * S, Dm)

    # fc -> dropout(p=0) -> residual -> LayerNorm (fused, K-tiled)
    out2d = out_proj_residual_layernorm(
        context2d, params["wo"], params["bo"], x2d,
        params["gamma"], params["beta"],
        eps=ln_eps, compute_dtype=compute_dtype)
    return out2d.reshape(B, S, Dm)


# ----------------------------------------------------------------------------
# Parameter init (deterministic, synthetic) + one-time QKV fusion
# ----------------------------------------------------------------------------
def init_params(key, dim_model):
    ks = jax.random.split(key, 8)
    s = 1.0 / math.sqrt(dim_model)

    def w(k):
        return (jax.random.uniform(k, (dim_model, dim_model), jnp.float32) - 0.5) * 2 * s

    def b(k):
        return (jax.random.uniform(k, (1, dim_model), jnp.float32) - 0.5) * 2 * s

    return {
        "wq": w(ks[0]), "bq": b(ks[1]),
        "wk": w(ks[2]), "bk": b(ks[3]),
        "wv": w(ks[4]), "bv": b(ks[5]),
        "wo": w(ks[6]), "bo": b(ks[7]),
        "gamma": jnp.ones((1, dim_model), jnp.float32),
        "beta": jnp.zeros((1, dim_model), jnp.float32),
    }


def fuse_qkv_params(p):
    """Pre-fuse Q/K/V projection weights ONCE, outside the jitted forward."""
    return {
        "w_qkv": jnp.stack([p["wq"], p["wk"], p["wv"]], axis=0),  # (3, Dm, Dm)
        "b_qkv": jnp.stack([p["bq"], p["bk"], p["bv"]], axis=0),  # (3, 1, Dm)
        "wo": p["wo"], "bo": p["bo"],
        "gamma": p["gamma"], "beta": p["beta"],
    }


# ----------------------------------------------------------------------------
# Pure-JAX reference (mirrors the PyTorch module exactly, f32)
# ----------------------------------------------------------------------------
def multi_head_attention_reference(x, p, num_head, eps=1e-5):
    B, S, Dm = x.shape
    Dh = Dm // num_head
    x2d = x.reshape(B * S, Dm)
    Q = (x2d @ p["wq"] + p["bq"]).reshape(B * num_head, S, Dh)
    K = (x2d @ p["wk"] + p["bk"]).reshape(B * num_head, S, Dh)
    V = (x2d @ p["wv"] + p["bv"]).reshape(B * num_head, S, Dh)
    scale = Dh ** (-0.5)
    att = jax.nn.softmax(jnp.einsum("bqd,bkd->bqk", Q, K) * scale, axis=-1)
    ctx = jnp.einsum("bqk,bkd->bqd", att, V).reshape(B * S, Dm)
    out = ctx @ p["wo"] + p["bo"] + x2d
    mean = out.mean(-1, keepdims=True)
    var = ((out - mean) ** 2).mean(-1, keepdims=True)
    out = (out - mean) / jnp.sqrt(var + eps) * p["gamma"] + p["beta"]
    return out.reshape(B, S, Dm)


if __name__ == "__main__":
    B, S, DIM_MODEL, NUM_HEAD = 2, 8, 32, 4

    key = jax.random.PRNGKey(0)
    kx, kp = jax.random.split(key)
    x = jax.random.normal(kx, (B, S, DIM_MODEL), jnp.float32)
    raw_params = init_params(kp, DIM_MODEL)
    params = fuse_qkv_params(raw_params)  # one-time weight fusion, outside jit

    # compute_dtype=bfloat16 (default) runs the MXU matmuls at native bf16 rate
    # with f32 accumulation; pass compute_dtype=jnp.float32 for strict parity.
    fwd = jax.jit(functools.partial(multi_head_attention, num_head=NUM_HEAD))
    out = jax.block_until_ready(fwd(x, params))

    assert out.shape == (B, S, DIM_MODEL)
    assert out.dtype == jnp.float32
    assert bool(jnp.all(jnp.isfinite(out)))

    ref = multi_head_attention_reference(x, raw_params, NUM_HEAD)
    max_err = float(jnp.max(jnp.abs(out - ref)))
    # bf16 MXU operands + approx softmax reciprocal -> loose tolerance vs f32 ref
    assert max_err < 1e-1, f"max abs err {max_err}"
    print("KERNEL_OK")
</pallas_src>

<mosaic_0001>
module attributes {stable_mosaic.version = 11 : i64} {
  func.func @_flash_attn_kernel(%arg0: i32, %arg1: i32, %arg2: i32, %arg3: memref<8x8x8xf32, #tpu.memory_space<vmem>>, %arg4: memref<8x8x8xf32, #tpu.memory_space<vmem>>, %arg5: memref<8x8x8xf32, #tpu.memory_space<vmem>>, %arg6: memref<8x8x8xf32, #tpu.memory_space<vmem>>, %arg7: memref<8x8x1xf32, #tpu.memory_space<vmem>>, %arg8: memref<8x8x1xf32, #tpu.memory_space<vmem>>, %arg9: memref<8x8x8xf32, #tpu.memory_space<vmem>>) attributes {dimension_semantics = [#tpu.dimension_semantics<parallel>, #tpu.dimension_semantics<parallel>, #tpu.dimension_semantics<arbitrary>], iteration_bounds = array<i64: 1, 1, 1>, scalar_prefetch = 0 : i64, scratch_operands = 3 : i64, tpu.core_type = #tpu.core_type<tc>, window_params = [{transform_indices = @transform_0, window_bounds = array<i64: 8, 8, 8>}, {transform_indices = @transform_1, window_bounds = array<i64: 8, 8, 8>}, {transform_indices = @transform_2, window_bounds = array<i64: 8, 8, 8>}, {transform_indices = @transform_3, window_bounds = array<i64: 8, 8, 8>}]} {
    %c0_i32 = arith.constant 0 : i32
    %0 = arith.cmpi eq, %arg2, %c0_i32 : i32
    %1 = arith.extui %0 : i1 to i32
    %c0_i32_0 = arith.constant 0 : i32
    %2 = arith.cmpi ne, %1, %c0_i32_0 : i32
    scf.if %2 {
      %cst_33 = arith.constant 0xFF800000 : f32
      %38 = vector.broadcast %cst_33 : f32 to vector<8x8x1xf32>
      %c0_34 = arith.constant 0 : index
      %c0_35 = arith.constant 0 : index
      %c0_36 = arith.constant 0 : index
      %39 = vector.load %arg7[%c0_34, %c0_35, %c0_36] : memref<8x8x1xf32, #tpu.memory_space<vmem>>, vector<8x8x1xf32>
      tpu.vector_store %arg7[%c0_34, %c0_35, %c0_36], %38 {strides = array<i32>} : memref<8x8x1xf32, #tpu.memory_space<vmem>>, vector<8x8x1xf32>,
      %cst_37 = arith.constant 0.000000e+00 : f32
      %40 = vector.broadcast %cst_37 : f32 to vector<8x8x1xf32>
      %c0_38 = arith.constant 0 : index
      %c0_39 = arith.constant 0 : index
      %c0_40 = arith.constant 0 : index
      %41 = vector.load %arg8[%c0_38, %c0_39, %c0_40] : memref<8x8x1xf32, #tpu.memory_space<vmem>>, vector<8x8x1xf32>
      tpu.vector_store %arg8[%c0_38, %c0_39, %c0_40], %40 {strides = array<i32>} : memref<8x8x1xf32, #tpu.memory_space<vmem>>, vector<8x8x1xf32>,
      %cst_41 = arith.constant 0.000000e+00 : f32
      %42 = vector.broadcast %cst_41 : f32 to vector<8x8x8xf32>
      %c0_42 = arith.constant 0 : index
      %c0_43 = arith.constant 0 : index
      %c0_44 = arith.constant 0 : index
      %43 = vector.load %arg9[%c0_42, %c0_43, %c0_44] : memref<8x8x8xf32, #tpu.memory_space<vmem>>, vector<8x8x8xf32>
      tpu.vector_store %arg9[%c0_42, %c0_43, %c0_44], %42 {strides = array<i32>} : memref<8x8x8xf32, #tpu.memory_space<vmem>>, vector<8x8x8xf32>,
    } else {
    }
    %c0 = arith.constant 0 : index
    %c0_1 = arith.constant 0 : index
    %c0_2 = arith.constant 0 : index
    %3 = vector.load %arg3[%c0, %c0_1, %c0_2] : memref<8x8x8xf32, #tpu.memory_space<vmem>>, vector<8x8x8xf32>
    %cst = arith.constant 0.353553385 : f32
    %4 = vector.broadcast %cst : f32 to vector<8x8x8xf32>
    %5 = arith.mulf %3, %4 : vector<8x8x8xf32>
    %6 = arith.truncf %5 : vector<8x8x8xf32> to vector<8x8x8xbf16>
    %c0_3 = arith.constant 0 : index
    %c0_4 = arith.constant 0 : index
    %c0_5 = arith.constant 0 : index
    %7 = vector.load %arg4[%c0_3, %c0_4, %c0_5] : memref<8x8x8xf32, #tpu.memory_space<vmem>>, vector<8x8x8xf32>
    %8 = arith.truncf %7 : vector<8x8x8xf32> to vector<8x8x8xbf16>
    %cst_6 = arith.constant dense<0.000000e+00> : vector<8x8x8xf32>
    %9 = tpu.matmul %6, %8, %cst_6 {dimension_numbers = #tpu.dot_dimension_numbers<[2], [2], [1], [1], [0, 0, 0, 1, 1, 1], [0], [0]>} : vector<8x8x8xbf16>, vector<8x8x8xbf16>, vector<8x8x8xf32> -> vector<8x8x8xf32>
    %c0_7 = arith.constant 0 : index
    %c0_8 = arith.constant 0 : index
    %c0_9 = arith.constant 0 : index
    %10 = vector.load %arg7[%c0_7, %c0_8, %c0_9] : memref<8x8x1xf32, #tpu.memory_space<vmem>>, vector<8x8x1xf32>
    %cst_10 = arith.constant dense<0xFF800000> : vector<8x8xf32>
    %11 = vector.multi_reduction <maximumf>, %9, %cst_10 [2] : vector<8x8x8xf32> to vector<8x8xf32>
    %12 = vector.shape_cast %11 : vector<8x8xf32> to vector<8x8x1xf32>
    %13 = arith.maximumf %10, %12 : vector<8x8x1xf32>
    %14 = arith.subf %10, %13 : vector<8x8x1xf32>
    %15 = math.exp %14 : vector<8x8x1xf32>
    %16 = vector.broadcast %13 : vector<8x8x1xf32> to vector<8x8x8xf32>
    %17 = arith.subf %9, %16 : vector<8x8x8xf32>
    %18 = math.exp %17 : vector<8x8x8xf32>
    %c0_11 = arith.constant 0 : index
    %c0_12 = arith.constant 0 : index
    %c0_13 = arith.constant 0 : index
    %19 = vector.load %arg8[%c0_11, %c0_12, %c0_13] : memref<8x8x1xf32, #tpu.memory_space<vmem>>, vector<8x8x1xf32>
    %20 = arith.mulf %15, %19 : vector<8x8x1xf32>
    %cst_14 = arith.constant dense<0.000000e+00> : vector<8x8xf32>
    %21 = vector.multi_reduction <add>, %18, %cst_14 [2] : vector<8x8x8xf32> to vector<8x8xf32>
    %22 = vector.shape_cast %21 : vector<8x8xf32> to vector<8x8x1xf32>
    %23 = arith.addf %20, %22 : vector<8x8x1xf32>
    %c0_15 = arith.constant 0 : index
    %c0_16 = arith.constant 0 : index
    %c0_17 = arith.constant 0 : index
    %24 = vector.load %arg8[%c0_15, %c0_16, %c0_17] : memref<8x8x1xf32, #tpu.memory_space<vmem>>, vector<8x8x1xf32>
    tpu.vector_store %arg8[%c0_15, %c0_16, %c0_17], %23 {strides = array<i32>} : memref<8x8x1xf32, #tpu.memory_space<vmem>>, vector<8x8x1xf32>,
    %c0_18 = arith.constant 0 : index
    %c0_19 = arith.constant 0 : index
    %c0_20 = arith.constant 0 : index
    %25 = vector.load %arg9[%c0_18, %c0_19, %c0_20] : memref<8x8x8xf32, #tpu.memory_space<vmem>>, vector<8x8x8xf32>
    %26 = vector.broadcast %15 : vector<8x8x1xf32> to vector<8x8x8xf32>
    %27 = arith.mulf %26, %25 : vector<8x8x8xf32>
    %28 = arith.truncf %18 : vector<8x8x8xf32> to vector<8x8x8xbf16>
    %c0_21 = arith.constant 0 : index
    %c0_22 = arith.constant 0 : index
    %c0_23 = arith.constant 0 : index
    %29 = vector.load %arg5[%c0_21, %c0_22, %c0_23] : memref<8x8x8xf32, #tpu.memory_space<vmem>>, vector<8x8x8xf32>
    %30 = arith.truncf %29 : vector<8x8x8xf32> to vector<8x8x8xbf16>
    %cst_24 = arith.constant dense<0.000000e+00> : vector<8x8x8xf32>
    %31 = tpu.matmul %28, %30, %cst_24 {dimension_numbers = #tpu.dot_dimension_numbers<[2], [1], [1], [2], [0, 0, 0, 1, 1, 2], [0], [0]>} : vector<8x8x8xbf16>, vector<8x8x8xbf16>, vector<8x8x8xf32> -> vector<8x8x8xf32>
    %32 = arith.addf %27, %31 : vector<8x8x8xf32>
    %c0_25 = arith.constant 0 : index
    %c0_26 = arith.constant 0 : index
    %c0_27 = arith.constant 0 : index
    %33 = vector.load %arg9[%c0_25, %c0_26, %c0_27] : memref<8x8x8xf32, #tpu.memory_space<vmem>>, vector<8x8x8xf32>
    tpu.vector_store %arg9[%c0_25, %c0_26, %c0_27], %32 {strides = array<i32>} : memref<8x8x8xf32, #tpu.memory_space<vmem>>, vector<8x8x8xf32>,
    %c0_28 = arith.constant 0 : index
    %c0_29 = arith.constant 0 : index
    %c0_30 = arith.constant 0 : index
    %34 = vector.load %arg7[%c0_28, %c0_29, %c0_30] : memref<8x8x1xf32, #tpu.memory_space<vmem>>, vector<8x8x1xf32>
    tpu.vector_store %arg7[%c0_28, %c0_29, %c0_30], %13 {strides = array<i32>} : memref<8x8x1xf32, #tpu.memory_space<vmem>>, vector<8x8x1xf32>,
    %c0_i32_31 = arith.constant 0 : i32
    %35 = arith.cmpi eq, %arg2, %c0_i32_31 : i32
    %36 = arith.extui %35 : i1 to i32
    %c0_i32_32 = arith.constant 0 : i32
    %37 = arith.cmpi ne, %36, %c0_i32_32 : i32
    scf.if %37 {
      %c0_33 = arith.constant 0 : index
      %c0_34 = arith.constant 0 : index
      %c0_35 = arith.constant 0 : index
      %38 = vector.load %arg8[%c0_33, %c0_34, %c0_35] : memref<8x8x1xf32, #tpu.memory_space<vmem>>, vector<8x8x1xf32>
      %39 = tpu.reciprocal %38 {approx = true} : vector<8x8x1xf32> -> vector<8x8x1xf32>
      %c0_36 = arith.constant 0 : index
      %c0_37 = arith.constant 0 : index
      %c0_38 = arith.constant 0 : index
      %40 = vector.load %arg9[%c0_36, %c0_37, %c0_38] : memref<8x8x8xf32, #tpu.memory_space<vmem>>, vector<8x8x8xf32>
      %41 = vector.broadcast %39 : vector<8x8x1xf32> to vector<8x8x8xf32>
      %42 = arith.mulf %40, %41 : vector<8x8x8xf32>
      %c0_39 = arith.constant 0 : index
      %c0_40 = arith.constant 0 : index
      %c0_41 = arith.constant 0 : index
      %43 = vector.load %arg6[%c0_39, %c0_40, %c0_41] : memref<8x8x8xf32, #tpu.memory_space<vmem>>, vector<8x8x8xf32>
      tpu.vector_store %arg6[%c0_39, %c0_40, %c0_41], %42 {strides = array<i32>} : memref<8x8x8xf32, #tpu.memory_space<vmem>>, vector<8x8x8xf32>,
    } else {
    }
    return
  }
  func.func @transform_0(%arg0: i32, %arg1: i32, %arg2: i32) -> (i32, i32, i32) {
    %c0_i32 = arith.constant 0 : i32
    %c0_i32_0 = arith.constant 0 : i32
    return %arg0, %arg1, %c0_i32 : i32, i32, i32
  }
  func.func @transform_1(%arg0: i32, %arg1: i32, %arg2: i32) -> (i32, i32, i32) {
    %c0_i32 = arith.constant 0 : i32
    %c0_i32_0 = arith.constant 0 : i32
    return %arg0, %arg2, %c0_i32 : i32, i32, i32
  }
  func.func @transform_2(%arg0: i32, %arg1: i32, %arg2: i32) -> (i32, i32, i32) {
    %c0_i32 = arith.constant 0 : i32
    %c0_i32_0 = arith.constant 0 : i32
    return %arg0, %arg2, %c0_i32 : i32, i32, i32
  }
  func.func @transform_3(%arg0: i32, %arg1: i32, %arg2: i32) -> (i32, i32, i32) {
    %c0_i32 = arith.constant 0 : i32
    %c0_i32_0 = arith.constant 0 : i32
    return %arg0, %arg1, %c0_i32 : i32, i32, i32
  }
}

module attributes {stable_mosaic.version = 11 : i64} {
  func.func @_qkv_proj_kernel(%arg0: i32, %arg1: i32, %arg2: i32, %arg3: i32, %arg4: memref<16x32xf32, #tpu.memory_space<vmem>>, %arg5: memref<1x32x32xf32, #tpu.memory_space<vmem>>, %arg6: memref<1x1x32xf32, #tpu.memory_space<vmem>>, %arg7: memref<1x16x32xf32, #tpu.memory_space<vmem>>, %arg8: memref<16x32xf32, #tpu.memory_space<vmem>>) attributes {dimension_semantics = [#tpu.dimension_semantics<parallel>, #tpu.dimension_semantics<parallel>, #tpu.dimension_semantics<parallel>, #tpu.dimension_semantics<arbitrary>], iteration_bounds = array<i64: 3, 1, 1, 1>, scalar_prefetch = 0 : i64, scratch_operands = 1 : i64, tpu.core_type = #tpu.core_type<tc>, window_params = [{transform_indices = @transform_0, window_bounds = array<i64: 16, 32>}, {transform_indices = @transform_1, window_bounds = array<i64: 1, 32, 32>}, {transform_indices = @transform_2, window_bounds = array<i64: 1, 1, 32>}, {transform_indices = @transform_3, window_bounds = array<i64: 1, 16, 32>}]} {
    %c0_i32 = arith.constant 0 : i32
    %0 = arith.cmpi eq, %arg3, %c0_i32 : i32
    %1 = arith.extui %0 : i1 to i32
    %c0_i32_0 = arith.constant 0 : i32
    %2 = arith.cmpi ne, %1, %c0_i32_0 : i32
    scf.if %2 {
      %cst_11 = arith.constant 0.000000e+00 : f32
      %15 = vector.broadcast %cst_11 : f32 to vector<16x32xf32>
      %c0_12 = arith.constant 0 : index
      %c0_13 = arith.constant 0 : index
      %16 = vector.load %arg8[%c0_12, %c0_13] : memref<16x32xf32, #tpu.memory_space<vmem>>, vector<16x32xf32>
      tpu.vector_store %arg8[%c0_12, %c0_13], %15 {strides = array<i32>} : memref<16x32xf32, #tpu.memory_space<vmem>>, vector<16x32xf32>,
    } else {
    }
    %c0 = arith.constant 0 : index
    %c0_1 = arith.constant 0 : index
    %3 = vector.load %arg8[%c0, %c0_1] : memref<16x32xf32, #tpu.memory_space<vmem>>, vector<16x32xf32>
    %c0_2 = arith.constant 0 : index
    %c0_3 = arith.constant 0 : index
    %4 = vector.load %arg4[%c0_2, %c0_3] : memref<16x32xf32, #tpu.memory_space<vmem>>, vector<16x32xf32>
    %5 = arith.truncf %4 : vector<16x32xf32> to vector<16x32xbf16>
    %c0_4 = arith.constant 0 : index
    %c0_5 = arith.constant 0 : index
    %c0_6 = arith.constant 0 : index
    %6 = vector.load %arg5[%c0_4, %c0_5, %c0_6] : memref<1x32x32xf32, #tpu.memory_space<vmem>>, vector<1x32x32xf32>
    %7 = vector.shape_cast %6 : vector<1x32x32xf32> to vector<32x32xf32>
    %8 = arith.truncf %7 : vector<32x32xf32> to vector<32x32xbf16>
    %cst = arith.constant dense<0.000000e+00> : vector<16x32xf32>
    %9 = tpu.matmul %5, %8, %cst {dimension_numbers = #tpu.dot_dimension_numbers<[1], [0], [0], [1], [0, 0, 1, 1], [], []>} : vector<16x32xbf16>, vector<32x32xbf16>, vector<16x32xf32> -> vector<16x32xf32>
    %10 = arith.addf %3, %9 : vector<16x32xf32>
    %c0_7 = arith.constant 0 : index
    %c0_8 = arith.constant 0 : index
    %11 = vector.load %arg8[%c0_7, %c0_8] : memref<16x32xf32, #tpu.memory_space<vmem>>, vector<16x32xf32>
    tpu.vector_store %arg8[%c0_7, %c0_8], %10 {strides = array<i32>} : memref<16x32xf32, #tpu.memory_space<vmem>>, vector<16x32xf32>,
    %c0_i32_9 = arith.constant 0 : i32
    %12 = arith.cmpi eq, %arg3, %c0_i32_9 : i32
    %13 = arith.extui %12 : i1 to i32
    %c0_i32_10 = arith.constant 0 : i32
    %14 = arith.cmpi ne, %13, %c0_i32_10 : i32
    scf.if %14 {
      %c0_11 = arith.constant 0 : index
      %c0_12 = arith.constant 0 : index
      %15 = vector.load %arg8[%c0_11, %c0_12] : memref<16x32xf32, #tpu.memory_space<vmem>>, vector<16x32xf32>
      %c0_13 = arith.constant 0 : index
      %c0_14 = arith.constant 0 : index
      %c0_15 = arith.constant 0 : index
      %16 = vector.load %arg6[%c0_13, %c0_14, %c0_15] : memref<1x1x32xf32, #tpu.memory_space<vmem>>, vector<1x1x32xf32>
      %17 = vector.shape_cast %16 : vector<1x1x32xf32> to vector<1x32xf32>
      %18 = vector.broadcast %17 : vector<1x32xf32> to vector<16x32xf32>
      %19 = arith.addf %15, %18 : vector<16x32xf32>
      %c0_16 = arith.constant 0 : index
      %c0_17 = arith.constant 0 : index
      %c0_18 = arith.constant 0 : index
      %20 = vector.load %arg7[%c0_16, %c0_17, %c0_18] : memref<1x16x32xf32, #tpu.memory_space<vmem>>, vector<1x16x32xf32>
      %21 = vector.shape_cast %20 : vector<1x16x32xf32> to vector<16x32xf32>
      %22 = vector.shape_cast %19 : vector<16x32xf32> to vector<1x16x32xf32>
      tpu.vector_store %arg7[%c0_16, %c0_17, %c0_18], %22 {strides = array<i32>} : memref<1x16x32xf32, #tpu.memory_space<vmem>>, vector<1x16x32xf32>,
    } else {
    }
    return
  }
  func.func @transform_0(%arg0: i32, %arg1: i32, %arg2: i32, %arg3: i32) -> (i32, i32) {
    %c0_i32 = arith.constant 0 : i32
    return %arg1, %arg3 : i32, i32
  }
  func.func @transform_1(%arg0: i32, %arg1: i32, %arg2: i32, %arg3: i32) -> (i32, i32, i32) {
    %c0_i32 = arith.constant 0 : i32
    return %arg0, %arg3, %arg2 : i32, i32, i32
  }
  func.func @transform_2(%arg0: i32, %arg1: i32, %arg2: i32, %arg3: i32) -> (i32, i32, i32) {
    %c0_i32 = arith.constant 0 : i32
    %c0_i32_0 = arith.constant 0 : i32
    return %arg0, %c0_i32, %arg2 : i32, i32, i32
  }
  func.func @transform_3(%arg0: i32, %arg1: i32, %arg2: i32, %arg3: i32) -> (i32, i32, i32) {
    %c0_i32 = arith.constant 0 : i32
    return %arg0, %arg1, %arg2 : i32, i32, i32
  }
}

module attributes {stable_mosaic.version = 11 : i64} {
  func.func @_out_ln_kernel(%arg0: i32, %arg1: i32, %arg2: memref<16x32xf32, #tpu.memory_space<vmem>>, %arg3: memref<32x32xf32, #tpu.memory_space<vmem>>, %arg4: memref<1x32xf32, #tpu.memory_space<vmem>>, %arg5: memref<16x32xf32, #tpu.memory_space<vmem>>, %arg6: memref<1x32xf32, #tpu.memory_space<vmem>>, %arg7: memref<1x32xf32, #tpu.memory_space<vmem>>, %arg8: memref<16x32xf32, #tpu.memory_space<vmem>>, %arg9: memref<16x32xf32, #tpu.memory_space<vmem>>) attributes {dimension_semantics = [#tpu.dimension_semantics<parallel>, #tpu.dimension_semantics<arbitrary>], iteration_bounds = array<i64: 1, 1>, scalar_prefetch = 0 : i64, scratch_operands = 1 : i64, tpu.core_type = #tpu.core_type<tc>, window_params = [{transform_indices = @transform_0, window_bounds = array<i64: 16, 32>}, {transform_indices = @transform_1, window_bounds = array<i64: 32, 32>}, {pipeline_mode = #tpu.pipeline_mode<synchronous>, transform_indices = @transform_2, window_bounds = array<i64: 1, 32>}, {transform_indices = @transform_3, window_bounds = array<i64: 16, 32>}, {pipeline_mode = #tpu.pipeline_mode<synchronous>, transform_indices = @transform_4, window_bounds = array<i64: 1, 32>}, {pipeline_mode = #tpu.pipeline_mode<synchronous>, transform_indices = @transform_5, window_bounds = array<i64: 1, 32>}, {transform_indices = @transform_6, window_bounds = array<i64: 16, 32>}]} {
    %c0_i32 = arith.constant 0 : i32
    %0 = arith.cmpi eq, %arg1, %c0_i32 : i32
    %1 = arith.extui %0 : i1 to i32
    %c0_i32_0 = arith.constant 0 : i32
    %2 = arith.cmpi ne, %1, %c0_i32_0 : i32
    scf.if %2 {
      %cst_10 = arith.constant 0.000000e+00 : f32
      %14 = vector.broadcast %cst_10 : f32 to vector<16x32xf32>
      %c0_11 = arith.constant 0 : index
      %c0_12 = arith.constant 0 : index
      %15 = vector.load %arg9[%c0_11, %c0_12] : memref<16x32xf32, #tpu.memory_space<vmem>>, vector<16x32xf32>
      tpu.vector_store %arg9[%c0_11, %c0_12], %14 {strides = array<i32>} : memref<16x32xf32, #tpu.memory_space<vmem>>, vector<16x32xf32>,
    } else {
    }
    %c0 = arith.constant 0 : index
    %c0_1 = arith.constant 0 : index
    %3 = vector.load %arg9[%c0, %c0_1] : memref<16x32xf32, #tpu.memory_space<vmem>>, vector<16x32xf32>
    %c0_2 = arith.constant 0 : index
    %c0_3 = arith.constant 0 : index
    %4 = vector.load %arg2[%c0_2, %c0_3] : memref<16x32xf32, #tpu.memory_space<vmem>>, vector<16x32xf32>
    %5 = arith.truncf %4 : vector<16x32xf32> to vector<16x32xbf16>
    %c0_4 = arith.constant 0 : index
    %c0_5 = arith.constant 0 : index
    %6 = vector.load %arg3[%c0_4, %c0_5] : memref<32x32xf32, #tpu.memory_space<vmem>>, vector<32x32xf32>
    %7 = arith.truncf %6 : vector<32x32xf32> to vector<32x32xbf16>
    %cst = arith.constant dense<0.000000e+00> : vector<16x32xf32>
    %8 = tpu.matmul %5, %7, %cst {dimension_numbers = #tpu.dot_dimension_numbers<[1], [0], [0], [1], [0, 0, 1, 1], [], []>} : vector<16x32xbf16>, vector<32x32xbf16>, vector<16x32xf32> -> vector<16x32xf32>
    %9 = arith.addf %3, %8 : vector<16x32xf32>
    %c0_6 = arith.constant 0 : index
    %c0_7 = arith.constant 0 : index
    %10 = vector.load %arg9[%c0_6, %c0_7] : memref<16x32xf32, #tpu.memory_space<vmem>>, vector<16x32xf32>
    tpu.vector_store %arg9[%c0_6, %c0_7], %9 {strides = array<i32>} : memref<16x32xf32, #tpu.memory_space<vmem>>, vector<16x32xf32>,
    %c0_i32_8 = arith.constant 0 : i32
    %11 = arith.cmpi eq, %arg1, %c0_i32_8 : i32
    %12 = arith.extui %11 : i1 to i32
    %c0_i32_9 = arith.constant 0 : i32
    %13 = arith.cmpi ne, %12, %c0_i32_9 : i32
    scf.if %13 {
      %c0_10 = arith.constant 0 : index
      %c0_11 = arith.constant 0 : index
      %14 = vector.load %arg9[%c0_10, %c0_11] : memref<16x32xf32, #tpu.memory_space<vmem>>, vector<16x32xf32>
      %c0_12 = arith.constant 0 : index
      %c0_13 = arith.constant 0 : index
      %15 = vector.load %arg4[%c0_12, %c0_13] : memref<1x32xf32, #tpu.memory_space<vmem>>, vector<1x32xf32>
      %16 = vector.broadcast %15 : vector<1x32xf32> to vector<16x32xf32>
      %17 = arith.addf %14, %16 : vector<16x32xf32>
      %c0_14 = arith.constant 0 : index
      %c0_15 = arith.constant 0 : index
      %18 = vector.load %arg5[%c0_14, %c0_15] : memref<16x32xf32, #tpu.memory_space<vmem>>, vector<16x32xf32>
      %19 = arith.addf %17, %18 : vector<16x32xf32>
      %cst_16 = arith.constant dense<0.000000e+00> : vector<16xf32>
      %20 = vector.multi_reduction <add>, %19, %cst_16 [1] : vector<16x32xf32> to vector<16xf32>
      %21 = vector.shape_cast %20 : vector<16xf32> to vector<16x1xf32>
      %cst_17 = arith.constant 3.200000e+01 : f32
      %22 = vector.broadcast %cst_17 : f32 to vector<16x1xf32>
      %23 = arith.divf %21, %22 : vector<16x1xf32>
      %24 = vector.broadcast %23 : vector<16x1xf32> to vector<16x32xf32>
      %25 = arith.subf %19, %24 : vector<16x32xf32>
      %26 = arith.mulf %25, %25 : vector<16x32xf32>
      %cst_18 = arith.constant dense<0.000000e+00> : vector<16xf32>
      %27 = vector.multi_reduction <add>, %26, %cst_18 [1] : vector<16x32xf32> to vector<16xf32>
      %28 = vector.shape_cast %27 : vector<16xf32> to vector<16x1xf32>
      %cst_19 = arith.constant 3.200000e+01 : f32
      %29 = vector.broadcast %cst_19 : f32 to vector<16x1xf32>
      %30 = arith.divf %28, %29 : vector<16x1xf32>
      %cst_20 = arith.constant 9.99999974E-6 : f32
      %31 = vector.broadcast %cst_20 : f32 to vector<16x1xf32>
      %32 = arith.addf %30, %31 : vector<16x1xf32>
      %33 = math.rsqrt %32 : vector<16x1xf32>
      %34 = vector.broadcast %33 : vector<16x1xf32> to vector<16x32xf32>
      %35 = arith.mulf %25, %34 : vector<16x32xf32>
      %c0_21 = arith.constant 0 : index
      %c0_22 = arith.constant 0 : index
      %36 = vector.load %arg6[%c0_21, %c0_22] : memref<1x32xf32, #tpu.memory_space<vmem>>, vector<1x32xf32>
      %37 = vector.broadcast %36 : vector<1x32xf32> to vector<16x32xf32>
      %38 = arith.mulf %35, %37 : vector<16x32xf32>
      %c0_23 = arith.constant 0 : index
      %c0_24 = arith.constant 0 : index
      %39 = vector.load %arg7[%c0_23, %c0_24] : memref<1x32xf32, #tpu.memory_space<vmem>>, vector<1x32xf32>
      %40 = vector.broadcast %39 : vector<1x32xf32> to vector<16x32xf32>
      %41 = arith.addf %38, %40 : vector<16x32xf32>
      %c0_25 = arith.constant 0 : index
      %c0_26 = arith.constant 0 : index
      %42 = vector.load %arg8[%c0_25, %c0_26] : memref<16x32xf32, #tpu.memory_space<vmem>>, vector<16x32xf32>
      tpu.vector_store %arg8[%c0_25, %c0_26], %41 {strides = array<i32>} : memref<16x32xf32, #tpu.memory_space<vmem>>, vector<16x32xf32>,
    } else {
    }
    return
  }
  func.func @transform_0(%arg0: i32, %arg1: i32) -> (i32, i32) {
    %c0_i32 = arith.constant 0 : i32
    return %arg0, %arg1 : i32, i32
  }
  func.func @transform_1(%arg0: i32, %arg1: i32) -> (i32, i32) {
    %c0_i32 = arith.constant 0 : i32
    %c0_i32_0 = arith.constant 0 : i32
    return %arg1, %c0_i32 : i32, i32
  }
  func.func @transform_2(%arg0: i32, %arg1: i32) -> (i32, i32) {
    %c0_i32 = arith.constant 0 : i32
    %c0_i32_0 = arith.constant 0 : i32
    %c0_i32_1 = arith.constant 0 : i32
    return %c0_i32, %c0_i32_0 : i32, i32
  }
  func.func @transform_3(%arg0: i32, %arg1: i32) -> (i32, i32) {
    %c0_i32 = arith.constant 0 : i32
    %c0_i32_0 = arith.constant 0 : i32
    return %arg0, %c0_i32 : i32, i32
  }
  func.func @transform_4(%arg0: i32, %arg1: i32) -> (i32, i32) {
    %c0_i32 = arith.constant 0 : i32
    %c0_i32_0 = arith.constant 0 : i32
    %c0_i32_1 = arith.constant 0 : i32
    return %c0_i32, %c0_i32_0 : i32, i32
  }
  func.func @transform_5(%arg0: i32, %arg1: i32) -> (i32, i32) {
    %c0_i32 = arith.constant 0 : i32
    %c0_i32_0 = arith.constant 0 : i32
    %c0_i32_1 = arith.constant 0 : i32
    return %c0_i32, %c0_i32_0 : i32, i32
  }
  func.func @transform_6(%arg0: i32, %arg1: i32) -> (i32, i32) {
    %c0_i32 = arith.constant 0 : i32
    %c0_i32_0 = arith.constant 0 : i32
    return %arg0, %c0_i32 : i32, i32
  }
}

</mosaic_0001>

<bundles_post_ra>
// kernel: squeeze.5
= control target key start
LH: loop header
LB: loop body
LE: loop exit
PB: predicated region body
PF: predicated region fallthrough
CT: control target
= control target key end

     0   :  { %vm3_vm0 = vcmask 64512   ;;  %s63_s8 = smov 112   ;;  %s64_s9 = smov 120   ;;  %s114_s0 = inlined_call_operand.vmem [shape: f32[1,16,32], index: 0, kind: input, shape index: {}]   ;;  %s115_s1 = inlined_call_operand.vmem [shape: f32[8,8,8], index: 1, kind: output, shape index: {}]  }
   0x1   :  { %v23_v0 = vld [vmem:[%s114_s0] sm:$0xff]   ;;  %v55_v1 = vld [vmem:[%s114_s0 + $0x8] sm:$0xff]   ;;  %s65_s13 = smov 104  }
   0x2   :  { %24 = vrot.lane.b32.xlu1 %v23_v0, %s63_s8  ;;  %11 = vrot.lane.b32.xlu0 %v23_v0, %s64_s9  ;;  %4 = vst.msk [vmem:[%s115_s1] ss:$4 sm:$0xff] %vm3_vm0, %v23_v0  }
   0x3   :  { %37 = vrot.lane.b32.xlu2 %v23_v0, %s65_s13  ;;  %50 = vst.msk [vmem:[%s115_s1 + $0x20] ss:$4 sm:$0xff] %vm3_vm0, %v55_v1  }
   0xa   :  { %31 = vrot.lane.b32.xlu1 %v55_v1, %s63_s8  ;;  %18 = vrot.lane.b32.xlu0 %v55_v1, %s64_s9 }
   0xb   :  { %44 = vrot.lane.b32.xlu2 %v55_v1, %s65_s13 }
  0x5d   :  { %v38_v2 = vpop.permute.xlu2 %37  }
  0x5e   :  { %57 = vst.msk [vmem:[%s115_s1 + $0x3] ss:$4 sm:$0xff] %vm3_vm0, %v38_v2  }
  0x65   :  { %v45_v3 = vpop.permute.xlu2 %44  }
  0x66   :  { %59 = vst.msk [vmem:[%s115_s1 + $0x23] ss:$4 sm:$0xff] %vm3_vm0, %v45_v3  }
  0x74   :  { %v25_v4 = vpop.permute.xlu1 %24   ;;  %v12_v5 = vpop.permute.xlu0 %11  }
  0x75   :  { %54 = vst.msk [vmem:[%s115_s1 + $0x2] ss:$4 sm:$0xff] %vm3_vm0, %v25_v4  }
  0x76   :  { %51 = vst.msk [vmem:[%s115_s1 + $0x1] ss:$4 sm:$0xff] %vm3_vm0, %v12_v5  }
  0x7c   :  { %v32_v6 = vpop.permute.xlu1 %31   ;;  %v19_v7 = vpop.permute.xlu0 %18  }
  0x7d   :  { %56 = vst.msk [vmem:[%s115_s1 + $0x22] ss:$4 sm:$0xff] %vm3_vm0, %v32_v6  }
  0x7e   :  { %53 = vst.msk [vmem:[%s115_s1 + $0x21] ss:$4 sm:$0xff] %vm3_vm0, %v19_v7  }

// kernel: multi_head_attention.3
= control target key start
LH: loop header
LB: loop body
LE: loop exit
PB: predicated region body
PF: predicated region fallthrough
CT: control target
= control target key end

     0   :  { %8 = vsyncpa [#allocation4], 0  ;;  %s910_s0 = inlined_call_operand.hbm [shape: f32[16,32], index: 0, kind: input, shape index: {}]   ;;  %s911_s1 = inlined_call_operand.hbm [shape: f32[3,32,32], index: 1, kind: input, shape index: {}]   ;;  %s912_s2 = inlined_call_operand.hbm [shape: f32[3,1,32], index: 2, kind: input, shape index: {}]   ;;  %s913_s3 = inlined_call_operand.vmem [shape: f32[3,16,32], index: 3, kind: output, shape index: {}]  }
   0x1   :  { %9 = vsyncpa [#allocation6], 0 }
   0x2   :  { %11 = vsyncpa [#allocation6 + $0x1], 0  ;;  %s772_s12 = smov 0   ;;  %s774_s13 = smov 0  }
   0x3   :  { %s776_s14 = smov 0   ;;  %s778_s15 = smov 0  }
   0x4   :  { %s780_s16 = smov 0   ;;  %s782_s17 = smov 0  }
   0x5 LB: > { %s43_s18 = sadd.s32 1, %s742_s16  ;;  %s82_s19 = sadd.s32 1, %s734_s14  ;;  %s746_s17 = sphi %s782_s17, %s17_s17   ;;  %s742_s16 = sphi %s780_s16, %s923_s16   ;;  %s738_s15 = sphi %s778_s15, %s922_s15   ;;  %s734_s14 = sphi %s776_s14, %s921_s14   ;;  %s730_s13 = sphi %s774_s13, %s920_s13   ;;  %s726_s12 = sphi %s772_s12, %s919_s12  }
   0x6   : > { %p45_p0 = scmp.ge.s32.totalorder %s43_s18, 3  ;;  %p89_p1 = scmp.ne.s32.totalorder %s734_s14, %s730_s13 }
   0x7   : > { %p90_p2 = scmp.eq.s32.totalorder %s746_s17, 0  ;;  %p547_p5 = scmp.lt.s32.totalorder %s746_s17, 3 }
   0x8   : > { %s925_s18 = smov (%p45_p0, %s43_s18), 0  ;;  %s195_s22 = sand.u32 1, %s746_s17  }
   0x9   : > { %p809_p3 = por %p90_p2, %p89_p1  ;;  %s75_s21 = ssub.s32 %s742_s16, %s925_s18 }
   0xa   : > { %p80_p4 = scmp.eq.s32.totalorder %s75_s21, 0  ;;  %s197_s23 = sand.u32 1, %s734_s14  }
   0xb   : > { %s514_s25 = sshll.u32 %s197_s23, 5  ;;  %s525_s26 = sshll.u32 %s742_s16, 5 }
   0xc   : > { %s819_s24 = scalar_select %p80_p4, %s734_s14, %s82_s19  }
   0xd   : > { %s207_s29 = scalar_lea.hbm %s911_s1, %s525_s26  ;;  %s199_s30 = scalar_lea.vmem [#allocation5], %s514_s25 }
   0xe   : > { %s210_s4 = sshll.u32 %s199_s30, 4  ;;  %s208_s5 = sshll.u32 %s207_s29, 4  ;;  %s211_s4 = int_to_ptr.vmem [resolvable:$true] %s210_s4  ;;  %s209_s5 = int_to_ptr.hbm [resolvable:$true] %s208_s5 }
   0xf   : > { %p829_p6 = pnand %p547_p5, %p809_p3  ;;  %s196_s7 = scalar_lea.sflag [#allocation6], %s195_s22 }
  0x10   : > { %s748_s8 = smov 128   ;;  %s749_s9 = smov 8  }
  0x11   : > { %542 = dma.hbm_to_vmem [thread:$0]  (!%p829_p6), %s209_s5, 512, %s211_s4, %s196_s7, %s748_s8, %s748_s8, %s749_s9  }
  0x12   : > { %s509_s10 = sadd.s32 4294967295, %s746_s17   ;;  %p95_p7 = scmp.ne.s32.totalorder %s730_s13, %s726_s12 }
  0x13   : > { %p838_p8 = scmp.eq.s32.totalorder %s509_s10, 0  ;;  %p511_p9 = scmp.ge.s32.totalorder %s746_s17, 1 }
  0x14   : > { %p164_p10 = scmp.lt.s32.totalorder %s746_s17, 4  ;;  %s179_s22 = sshll.u32 %s910_s0, 4  ;;  %s180_s22 = int_to_ptr.hbm [resolvable:$true] %s179_s22 }
  0x15   : > { %p846_p11 = por %p838_p8, %p95_p7  ;;  %s750_s25 = smov [#allocation3]  }
  0x16   : > { %p850_p12 = pnand %p511_p9, %p164_p10  ;;  %s181_s26 = sshll.u32 %s750_s25, 4  ;;  %s182_s26 = int_to_ptr.vmem [resolvable:$true] %s181_s26 }
  0x17   : > { %s227_s29 = scalar_lea.hbm %s912_s2, %s742_s16  ;;  %s223_s4 = scalar_lea.vmem [#allocation7], %s197_s23 }
  0x18   : > { %p535_p13 = pneg %p850_p12  ;;  %s229_s30 = sshll.u32 %s227_s29, 4  ;;  %s230_s30 = int_to_ptr.hbm [resolvable:$true] %s229_s30 }
  0x19   : > { %s231_s5 = sshll.u32 %s223_s4, 4  ;;  %240 = sbr.rel (%p850_p12) target bundleno = 192 (0xc0), region = 32  ;;  %s232_s5 = int_to_ptr.vmem [resolvable:$true] %s231_s5 }
  0x1a   : > { %p536_p0 = pnand %p535_p13, %p838_p8 }
  0x1b   : > { %545 = dma.hbm_to_vmem [thread:$0]  (!%p829_p6), %s230_s30, 16, %s232_s5, %s196_s7  }
  0x1c   : > { %538 = dma.hbm_to_vmem [thread:$0]  (!%p536_p0), %s180_s22, 256, %s182_s26, [#allocation4], %s748_s8, %s748_s8, %s749_s9  }
  0x1e   : > { %717 = dma.done.wait (%p838_p8), [#allocation4], 256  }
  0x1f   : > { %719 = vsyncadd (%p838_p8), [#allocation4], 4294967040  ;;  %s247_s21 = sand.u32 1, %s509_s10   ;;  %s249_s12 = sand.u32 1, %s730_s13  }
  0x20   : > { %s519_s23 = sshll.u32 %s249_s12, 5  ;;  %s248_s25 = scalar_lea.sflag [#allocation6], %s247_s21 }
  0x21   : > { %s251_s27 = scalar_lea.vmem [#allocation5], %s519_s23 }
  0x22   : > { %721 = dma.done.wait (%p846_p11), %s248_s25, 528  }
  0x23   : > { %723 = vsyncadd (%p846_p11), %s248_s25, 4294966768  ;;  %vm315_vm0 = vcmask 261120   ;;  %v751_v0 = vmov 0.0   ;;  %v325_v1 = vld [vmem:[%s251_s27 + $0x10] sm:$0xff]  ;;  %v326_v2 = vld [vmem:[%s251_s27 + $0x18] sm:$0xff]  ;;  %s260_s6 = scalar_lea.vmem [#allocation7], %s249_s12 }
  0x24   : > { %316 = vst.msk [vmem:[#allocation2] sm:$0xff] %vm315_vm0, %v751_v0  ;;  %v323_v3 = vld [vmem:[%s251_s27] sm:$0xff]  ;;  %v328_v4 = vpack.c.bf16 %v326_v2, %v325_v1  ;;  %v324_v5 = vld [vmem:[%s251_s27 + $0x8] sm:$0xff]  ;;  %v320_v7 = vld [vmem:[#allocation3] sm:$0xff]  ;;  %p298_p1 = scmp.lt.s32.totalorder %s738_s15, 2 }
  0x25   : > { %317 = vst.msk [vmem:[#allocation2 + $0x8] sm:$0xff] %vm315_vm0, %v751_v0  ;;  %v327_v6 = vpack.c.bf16 %v324_v5, %v323_v3  ;;  %v321_v8 = vld [vmem:[#allocation3 + $0x8] sm:$0xff]  ;;  %v601_v14 = vld [vmem:[%s260_s6] ss:$0 sm:$0xff] }
  0x26   : > { %339 = vmatpush.bf16.msra.mxu0 %v328_v4  ;;  %v322_v9 = vpack.c.bf16 %v321_v8, %v320_v7  ;;  %s927_s15 = smov (!%p298_p1, %s738_s15), 2 }
  0x27   : > { %s526_s7 = sshll.u32 %s927_s15, 4 }
  0x28   : > { %s308_s10 = scalar_lea.vmem %s913_s3, %s526_s7 }
  0x2a   : > { %340 = vmatpush.bf16.msra.mxu0 %v327_v6 }
  0x2b   : > { %v318_v10 = vld [vmem:[#allocation2] sm:$0xff] }
  0x2c   : > { %v319_v13 = vld [vmem:[#allocation2 + $0x8] sm:$0xff] }
  0x2d   : > { %522 = vmatmul.msk.bf16.vlgmr.msra.gmra.mxu0 %vm315_vm0, %v322_v9 }
  0xaa   : > { %v342_v11 = vpop.f32.mrf.mxu0 }
  0xab   : > { %v347_v12 = vadd.f32 %v342_v11, %v318_v10 }
  0xad   : > { %349 = vst.msk [vmem:[#allocation2] sm:$0xff] %vm315_vm0, %v347_v12 }
  0xb2   : > { %v344_v15 = vpop.f32.mrf.mxu0 }
  0xb3   : > { %v348_v16 = vadd.f32 %v344_v15, %v319_v13 }
  0xb4   : > { %v354_v17 = vld [vmem:[#allocation2] sm:$0xff] }
  0xb5   : > { %v360_v18 = vadd.f32 %v601_v14, %v354_v17  ;;  %350 = vst.msk [vmem:[#allocation2 + $0x8] sm:$0xff] %vm315_vm0, %v348_v16 }
  0xb7   : > { %362 = vst.msk [vmem:[%s308_s10] sm:$0xff] %vm315_vm0, %v360_v18 }
  0xbc   : > { %v355_v19 = vld [vmem:[#allocation2 + $0x8] sm:$0xff] }
  0xbd   : > { %v361_v20 = vadd.f32 %v601_v14, %v355_v19 }
  0xbf   : > { %363 = vst.msk [vmem:[%s308_s10 + $0x8] sm:$0xff] %vm315_vm0, %v361_v20 }
  0xc0 PF: > { %s17_s17 = sadd.s32 1, %s746_s17   ;;  %s919_s12 = smov %s730_s13 }
  0xc1   : > { %p14_p2 = scmp.ge.s32.totalorder %s17_s17, 5   ;;  %s920_s13 = smov %s734_s14 }
  0xc2   : > { %s921_s14 = smov %s819_s24  ;;  %s922_s15 = smov %s742_s16 }
  0xc3   : > { %s923_s16 = smov %s925_s18  ;;  %16 = sbr.rel (!%p14_p2) target bundleno = 5 (0x5), region = 97 }
  0xc8   :  { %400 = vsyncpa [#allocation4], 1 }
  0xc9   :  { %402 = vsyncpa [#allocation4 + $0x1], 1 }
  0xca   :  { %403 = vsyncpa [#allocation6], 1 }
  0xcb   :  { %405 = vsyncpa [#allocation6 + $0x1], 1 }

// kernel: multi_head_attention.5
= control target key start
LH: loop header
LB: loop body
LE: loop exit
PB: predicated region body
PF: predicated region fallthrough
CT: control target
= control target key end

     0   :  { %vm29_vm0 = vcmask 261120   ;;  %v204_v5 = vmov 0.0   ;;  %s291_s0 = inlined_call_operand.vmem [shape: f32[16,32], index: 0, kind: input, shape index: {}]   ;;  %s292_s1 = inlined_call_operand.vmem [shape: f32[32,32], index: 1, kind: input, shape index: {}]   ;;  %s293_s2 = inlined_call_operand.vmem [shape: f32[1,32], index: 2, kind: input, shape index: {}]   ;;  %s294_s3 = inlined_call_operand.vmem [shape: f32[16,32], index: 3, kind: input, shape index: {}]   ;;  %s295_s4 = inlined_call_operand.vmem [shape: f32[1,32], index: 4, kind: input, shape index: {}]   ;;  %s296_s5 = inlined_call_operand.vmem [shape: f32[1,32], index: 5, kind: input, shape index: {}]   ;;  %s297_s6 = inlined_call_operand.hbm [shape: f32[16,32], index: 6, kind: output, shape index: {}]  }
   0x1   :  { %v39_v0 = vld [vmem:[%s292_s1 + $0x10] sm:$0xff]  ;;  %v40_v1 = vld [vmem:[%s292_s1 + $0x18] sm:$0xff]  ;;  %v37_v2 = vld [vmem:[%s292_s1] sm:$0xff]  ;;  %30 = vst.msk [vmem:[#allocation2] sm:$0xff] %vm29_vm0, %v204_v5 }
   0x2   :  { %v42_v3 = vpack.c.bf16 %v40_v1, %v39_v0  ;;  %v38_v4 = vld [vmem:[%s292_s1 + $0x8] sm:$0xff]  ;;  %v34_v6 = vld [vmem:[%s291_s0] sm:$0xff]  ;;  %31 = vst.msk [vmem:[#allocation2 + $0x8] sm:$0xff] %vm29_vm0, %v204_v5 }
   0x3   :  { %v41_v7 = vpack.c.bf16 %v38_v4, %v37_v2  ;;  %v35_v8 = vld [vmem:[%s291_s0 + $0x8] sm:$0xff] }
   0x4   :  { %53 = vmatpush.bf16.msra.mxu0 %v42_v3 }
   0x5   :  { %11 = vsyncpa [#allocation4], 0  ;;  %v36_v9 = vpack.c.bf16 %v35_v8, %v34_v6  ;;  %v169_v14 = vld [vmem:[%s293_s2] ss:$0 sm:$0xff]  ;;  %v77_v23 = vld [vmem:[%s294_s3 + $0x8] sm:$0xff]  ;;  %v205_v27 = vmov 32.0  }
   0x6   :  { %v76_v18 = vld [vmem:[%s294_s3] sm:$0xff]  ;;  %172 = vrcp.f32 %v205_v27  ;;  %s151_s18 = sshll.u32 %s297_s6, 4  ;;  %s208_s19 = smov 8   ;;  %s152_s18 = int_to_ptr.hbm [resolvable:$true] %s151_s18 }
   0x7   :  { %v170_v58 = vld [vmem:[%s295_s4] ss:$0 sm:$0xff]  ;;  %s206_s4 = smov [#allocation3]  }
   0x8   :  { %54 = vmatpush.bf16.msra.mxu0 %v41_v7  ;;  %v32_v10 = vld [vmem:[#allocation2] sm:$0xff]  ;;  %s149_s15 = sshll.u32 %s206_s4, 4  ;;  %s150_s15 = int_to_ptr.vmem [resolvable:$true] %s149_s15 }
   0x9   :  { %v33_v13 = vld [vmem:[#allocation2 + $0x8] sm:$0xff]  ;;  %v171_v62 = vld [vmem:[%s296_s5] ss:$0 sm:$0xff]  ;;  %s207_s5 = smov 128  }
   0xb   :  { %163 = vmatmul.msk.bf16.vlgmr.msra.gmra.mxu0 %vm29_vm0, %v36_v9 }
   0xc   :  { %v173_v28 = vpop.eup %172 }
   0xd   :  { %v87_v29 = vmul.f32 32.0, %v173_v28  ;;  %vm91_vm1 = vweird.f32 %v173_v28 }
   0xf   :  { %v88_v30 = vsub.f32 1.0, %v87_v29 }
  0x11   :  { %v89_v31 = vmul.f32 %v173_v28, %v88_v30 }
  0x13   :  { %v90_v32 = vadd.f32 %v173_v28, %v89_v31 }
  0x15   :  { %v92_v33 = vsel %vm91_vm1, %v173_v28, %v90_v32 }
  0x88   :  { %v56_v11 = vpop.f32.mrf.mxu0 }
  0x89   :  { %v61_v12 = vadd.f32 %v56_v11, %v32_v10 }
  0x8b   :  { %63 = vst.msk [vmem:[#allocation2] sm:$0xff] %vm29_vm0, %v61_v12 }
  0x90   :  { %v58_v15 = vpop.f32.mrf.mxu0 }
  0x91   :  { %v62_v16 = vadd.f32 %v58_v15, %v33_v13 }
  0x92   :  { %v68_v17 = vld [vmem:[#allocation2] sm:$0xff] }
  0x93   :  { %64 = vst.msk [vmem:[#allocation2 + $0x8] sm:$0xff] %vm29_vm0, %v62_v16  ;;  %v74_v19 = vadd.f32 %v169_v14, %v68_v17 }
  0x95   :  { %v78_v20 = vadd.f32 %v76_v18, %v74_v19 }
  0x97   :  { %v80_v21 = vsel %vm29_vm0, %v78_v20, 0.0 }
  0x98   :  { %81 = vadd.xlane.f32.xlu0 %v80_v21 }
  0x9a   :  { %v69_v22 = vld [vmem:[#allocation2 + $0x8] sm:$0xff] }
  0x9b   :  { %v75_v24 = vadd.f32 %v169_v14, %v69_v22 }
  0x9d   :  { %v79_v25 = vadd.f32 %v77_v23, %v75_v24 }
  0x9f   :  { %v83_v26 = vsel %vm29_vm0, %v79_v25, 0.0 }
  0xa0   :  { %84 = vadd.xlane.f32.xlu0 %v83_v26 }
 0x10b   :  { %v82_v34 = vpop.xlane.xlu0 %81 }
 0x10c   :  { %v93_v35 = vmul.f32 %v92_v33, %v82_v34 }
 0x10e   :  { %v95_v36 = vsub.f32 %v78_v20, %v93_v35 }
 0x110   :  { %v97_v37 = vmul.f32 %v95_v36, %v95_v36 }
 0x112   :  { %v99_v38 = vsel %vm29_vm0, %v97_v37, 0.0 }
 0x113   :  { %100 = vadd.xlane.f32.xlu1 %v99_v38  ;;  %v85_v39 = vpop.xlane.xlu0 %84 }
 0x114   :  { %v94_v40 = vmul.f32 %v92_v33, %v85_v39 }
 0x116   :  { %v96_v41 = vsub.f32 %v79_v25, %v94_v40 }
 0x118   :  { %v98_v42 = vmul.f32 %v96_v41, %v96_v41 }
 0x11a   :  { %v102_v43 = vsel %vm29_vm0, %v98_v42, 0.0 }
 0x11b   :  { %103 = vadd.xlane.f32.xlu1 %v102_v43 }
 0x186   :  { %v101_v44 = vpop.xlane.xlu1 %100 }
 0x187   :  { %v105_v45 = vmul.f32 %v101_v44, %v92_v33 }
 0x189   :  { %v107_v46 = vadd.f32 1e-05, %v105_v45 }
 0x18b   :  { %174 = vrsqrt.f32 %v107_v46  ;;  %vm115_vm3 = vweird.f32 %v107_v46 }
 0x18e   :  { %v104_v47 = vpop.xlane.xlu1 %103 }
 0x18f   :  { %v106_v48 = vmul.f32 %v104_v47, %v92_v33 }
 0x191   :  { %v175_v49 = vpop.eup %174  ;;  %v108_v50 = vadd.f32 1e-05, %v106_v48 }
 0x192   :  { %v110_v51 = vmul.f32 %v175_v49, %v107_v46  ;;  %vm116_vm2 = vweird.f32 %v175_v49 }
 0x193   :  { %176 = vrsqrt.f32 %v108_v50  ;;  %vm117_vm4 = vmor %vm115_vm3, %vm116_vm2  ;;  %vm125_vm6 = vweird.f32 %v108_v50 }
 0x194   :  { %v111_v52 = vmul.f32 %v175_v49, %v110_v51 }
 0x196   :  { %v112_v53 = vmul.f32 0.5, %v111_v52 }
 0x198   :  { %v113_v54 = vsub.f32 1.5, %v112_v53 }
 0x199   :  { %v177_v55 = vpop.eup %176 }
 0x19a   :  { %v114_v56 = vmul.f32 %v175_v49, %v113_v54  ;;  %v120_v57 = vmul.f32 %v177_v55, %v108_v50  ;;  %vm126_vm5 = vweird.f32 %v177_v55 }
 0x19b   :  { %vm127_vm7 = vmor %vm125_vm6, %vm126_vm5 }
 0x19c   :  { %v118_v59 = vsel %vm117_vm4, %v175_v49, %v114_v56  ;;  %v121_v60 = vmul.f32 %v177_v55, %v120_v57 }
 0x19d   :  { %v129_v61 = vmul.f32 %v118_v59, %v95_v36 }
 0x19e   :  { %v122_v63 = vmul.f32 0.5, %v121_v60 }
 0x19f   :  { %v135_v0 = vmul.f32 %v170_v58, %v129_v61 }
 0x1a0   :  { %v123_v1 = vsub.f32 1.5, %v122_v63 }
 0x1a1   :  { %v141_v2 = vadd.f32 %v171_v62, %v135_v0 }
 0x1a2   :  { %v124_v3 = vmul.f32 %v177_v55, %v123_v1 }
 0x1a3   :  { %143 = vst.msk [vmem:[#allocation3] sm:$0xff] %vm29_vm0, %v141_v2 }
 0x1a4   :  { %v128_v4 = vsel %vm127_vm7, %v177_v55, %v124_v3 }
 0x1a5   :  { %v130_v5 = vmul.f32 %v128_v4, %v96_v41 }
 0x1a7   :  { %v136_v6 = vmul.f32 %v170_v58, %v130_v5 }
 0x1a9   :  { %v142_v7 = vadd.f32 %v171_v62, %v136_v6 }
 0x1ab   :  { %144 = vst.msk [vmem:[#allocation3 + $0x8] sm:$0xff] %vm29_vm0, %v142_v7 }
 0x1ac   :  { %157 = dma.vmem_to_hbm [thread:$0]  %s150_s15, 256, %s152_s18, [#allocation4], %s207_s5, %s207_s5, %s208_s19  }
 0x1ad   :  { %202 = dma.done.wait [#allocation4], 256  }
 0x1ae   :  { %203 = vsyncadd [#allocation4], 4294967040 }
 0x1af   :  { %162 = vsyncpa [#allocation4], 1 }

// kernel: multi_head_attention.4
= control target key start
LH: loop header
LB: loop body
LE: loop exit
PB: predicated region body
PF: predicated region fallthrough
CT: control target
= control target key end

     0   :  { %vm36_vm0 = vcmask 64512   ;;  %vm19_vm1 = vcmask 7168   ;;  %v837_v50 = vmov -inf   ;;  %vm506_vm2 = vcmask 1043456   ;;  %s1145_s1 = inlined_call_operand.vmem [shape: f32[8,8,8], index: 1, kind: input, shape index: {}]   ;;  %s1146_s0 = inlined_call_operand.vmem [shape: f32[8,8,8], index: 0, kind: input, shape index: {}]   ;;  %s1147_s2 = inlined_call_operand.vmem [shape: f32[8,8,8], index: 2, kind: input, shape index: {}]   ;;  %s1148_s3 = inlined_call_operand.vmem [shape: f32[8,8,8], index: 3, kind: output, shape index: {}]  }
   0x1   :  { %v69_v0 = vld [vmem:[%s1145_s1] sm:$0xff]  ;;  %v71_v1 = vld [vmem:[%s1145_s1 + $0x10] sm:$0xff]  ;;  %v72_v2 = vld [vmem:[%s1145_s1 + $0x18] sm:$0xff]  ;;  %20 = vst.msk [vmem:[#allocation2] sm:$0xff] %vm19_vm1, %v837_v50 }
   0x2   :  { %v77_v3 = vpack.c.bf16 %v69_v0, %v69_v0  ;;  %v79_v4 = vpack.c.bf16 %v71_v1, %v71_v1  ;;  %v80_v5 = vpack.c.bf16 %v72_v2, %v72_v2  ;;  %v45_v6 = vld [vmem:[%s1146_s0] sm:$0xff]  ;;  %v47_v7 = vld [vmem:[%s1146_s0 + $0x10] sm:$0xff]  ;;  %v48_v8 = vld [vmem:[%s1146_s0 + $0x18] sm:$0xff]  ;;  %21 = vst.msk [vmem:[#allocation2 + $0x8] sm:$0xff] %vm19_vm1, %v837_v50 }
   0x3   :  { %v53_v9 = vmul.f32 0.35355338, %v45_v6  ;;  %v55_v10 = vmul.f32 0.35355338, %v47_v7  ;;  %v75_v14 = vld [vmem:[%s1145_s1 + $0x30] sm:$0xff]  ;;  %v70_v15 = vld [vmem:[%s1145_s1 + $0x8] sm:$0xff] }
   0x4   :  { %v90_v11 = vsel %vm36_vm0, %v77_v3, 0  ;;  %v128_v12 = vsel %vm36_vm0, %v79_v4, 0  ;;  %v147_v13 = vsel %vm36_vm0, %v80_v5, 0  ;;  %v76_v16 = vld [vmem:[%s1145_s1 + $0x38] sm:$0xff]  ;;  %v56_v17 = vmul.f32 0.35355338, %v48_v8 }
   0x5   :  { %99 = vmatpush.bf16.xpose.msra.mxu0 %v90_v11  ;;  %137 = vmatpush.bf16.xpose.msra.mxu2 %v128_v12  ;;  %v46_v18 = vld [vmem:[%s1146_s0 + $0x8] sm:$0xff]  ;;  %v83_v19 = vpack.c.bf16 %v75_v14, %v75_v14  ;;  %v78_v20 = vpack.c.bf16 %v70_v15, %v70_v15  ;;  %v84_v21 = vpack.c.bf16 %v76_v16, %v76_v16  ;;  %v73_v23 = vld [vmem:[%s1145_s1 + $0x20] sm:$0xff]  ;;  %v51_v36 = vld [vmem:[%s1146_s0 + $0x30] sm:$0xff] }
   0x6   :  { %156 = vmatpush.bf16.xpose.msra.mxu3 %v147_v13  ;;  %v74_v22 = vld [vmem:[%s1145_s1 + $0x28] sm:$0xff]  ;;  %v61_v24 = vpack.c.bf16 %v53_v9, %v53_v9  ;;  %v63_v25 = vpack.c.bf16 %v55_v10, %v55_v10  ;;  %v81_v27 = vpack.c.bf16 %v73_v23, %v73_v23  ;;  %v54_v31 = vmul.f32 0.35355338, %v46_v18  ;;  %v49_v37 = vld [vmem:[%s1146_s0 + $0x20] sm:$0xff]  ;;  %v52_v38 = vld [vmem:[%s1146_s0 + $0x38] sm:$0xff]  ;;  %22 = vst.msk [vmem:[#allocation2 + $0x10] sm:$0xff] %vm19_vm1, %v837_v50 }
   0x7   :  { %v82_v26 = vpack.c.bf16 %v74_v22, %v74_v22  ;;  %v204_v28 = vsel %vm36_vm0, %v83_v19, 0  ;;  %v109_v29 = vsel %vm36_vm0, %v78_v20, 0  ;;  %v223_v30 = vsel %vm36_vm0, %v84_v21, 0  ;;  %v50_v42 = vld [vmem:[%s1146_s0 + $0x28] sm:$0xff]  ;;  %23 = vst.msk [vmem:[#allocation2 + $0x18] sm:$0xff] %vm19_vm1, %v837_v50 }
   0x8   :  { %v64_v32 = vpack.c.bf16 %v56_v17, %v56_v17  ;;  %118 = vmatpush.bf16.xpose.msra.mxu1 %v109_v29  ;;  %v166_v34 = vsel %vm36_vm0, %v81_v27, 0  ;;  %v62_v35 = vpack.c.bf16 %v54_v31, %v54_v31  ;;  %v59_v39 = vmul.f32 0.35355338, %v51_v36  ;;  %24 = vst.msk [vmem:[#allocation2 + $0x20] sm:$0xff] %vm19_vm1, %v837_v50  ;;  %v238_v11 = vld [vmem:[#allocation2] sm:$0xff] }
   0x9   :  { %v185_v33 = vsel %vm36_vm0, %v82_v26, 0  ;;  %v57_v40 = vmul.f32 0.35355338, %v49_v37  ;;  %v60_v41 = vmul.f32 0.35355338, %v52_v38  ;;  %25 = vst.msk [vmem:[#allocation2 + $0x28] sm:$0xff] %vm19_vm1, %v837_v50 }
   0xa   :  { %v67_v43 = vpack.c.bf16 %v59_v39, %v59_v39  ;;  %v58_v45 = vmul.f32 0.35355338, %v50_v42  ;;  %26 = vst.msk [vmem:[#allocation2 + $0x30] sm:$0xff] %vm19_vm1, %v837_v50  ;;  %v838_v9 = vmov 0   ;;  %v839_v10 = vmov 0.0   ;;  %v239_v16 = vld [vmem:[#allocation2 + $0x8] sm:$0xff] }
   0xb   :  { %v65_v44 = vpack.c.bf16 %v57_v40, %v57_v40  ;;  %v68_v46 = vpack.c.bf16 %v60_v41, %v60_v41  ;;  %27 = vst.msk [vmem:[#allocation2 + $0x38] sm:$0xff] %vm19_vm1, %v837_v50  ;;  %788 = vset.pattern.permute.xlu1 %v838_v9  ;;  %786 = vset.pattern.permute.xlu2 %v838_v9 }
   0xc   :  { %767 = vmatmul.msk.bf16.vlgmr.msra.gmra.mxu0 %vm36_vm0, %v61_v24  ;;  %769 = vmatmul.msk.bf16.vlgmr.msra.gmra.mxu2 %vm36_vm0, %v63_v25  ;;  %v66_v47 = vpack.c.bf16 %v58_v45, %v58_v45  ;;  %38 = vst.msk [vmem:[#allocation4 + $0x8] sm:$0xff] %vm36_vm0, %v839_v10 }
   0xd   :  { %213 = vmatpush.bf16.xpose.msrb.mxu2 %v204_v28  ;;  %175 = vmatpush.bf16.xpose.msrb.mxu0 %v166_v34  ;;  %28 = vst.msk [vmem:[#allocation3] sm:$0xff] %vm19_vm1, %v839_v10  ;;  %v240_v14 = vld [vmem:[#allocation2 + $0x10] sm:$0xff] }
   0xe   :  { %232 = vmatpush.bf16.xpose.msrb.mxu3 %v223_v30  ;;  %787 = vset.pattern.permute.xlu0 %v838_v9  ;;  %29 = vst.msk [vmem:[#allocation3 + $0x8] sm:$0xff] %vm19_vm1, %v839_v10  ;;  %v241_v21 = vld [vmem:[#allocation2 + $0x18] sm:$0xff]  ;;  %v487_v9 = vld [vmem:[%s1147_s2] sm:$0xff] }
   0xf   :  { %770 = vmatmul.msk.bf16.vlgmr.msra.gmra.mxu3 %vm36_vm0, %v64_v32  ;;  %768 = vmatmul.msk.bf16.vlgmr.msra.gmra.mxu1 %vm36_vm0, %v62_v35  ;;  %30 = vst.msk [vmem:[#allocation3 + $0x10] sm:$0xff] %vm19_vm1, %v839_v10  ;;  %v242_v27 = vld [vmem:[#allocation2 + $0x20] sm:$0xff] }
  0x10   :  { %194 = vmatpush.bf16.xpose.msrb.mxu1 %v185_v33  ;;  %31 = vst.msk [vmem:[#allocation3 + $0x18] sm:$0xff] %vm19_vm1, %v839_v10  ;;  %v243_v25 = vld [vmem:[#allocation2 + $0x28] sm:$0xff] }
  0x11   :  { %32 = vst.msk [vmem:[#allocation3 + $0x20] sm:$0xff] %vm19_vm1, %v839_v10  ;;  %v244_v26 = vld [vmem:[#allocation2 + $0x30] sm:$0xff] }
  0x12   :  { %33 = vst.msk [vmem:[#allocation3 + $0x28] sm:$0xff] %vm19_vm1, %v839_v10  ;;  %v990_v38 = vld [vmem:[#allocation2 + $0x38] sm:$0xff] }
  0x13   :  { %34 = vst.msk [vmem:[#allocation3 + $0x30] sm:$0xff] %vm19_vm1, %v839_v10 }
  0x14   :  { %35 = vst.msk [vmem:[#allocation3 + $0x38] sm:$0xff] %vm19_vm1, %v839_v10 }
  0x15   :  { %37 = vst.msk [vmem:[#allocation4] sm:$0xff] %vm36_vm0, %v839_v10 }
  0x16   :  { %39 = vst.msk [vmem:[#allocation4 + $0x10] sm:$0xff] %vm36_vm0, %v839_v10 }
  0x17   :  { %40 = vst.msk [vmem:[#allocation4 + $0x18] sm:$0xff] %vm36_vm0, %v839_v10 }
  0x18   :  { %41 = vst.msk [vmem:[#allocation4 + $0x20] sm:$0xff] %vm36_vm0, %v839_v10 }
  0x19   :  { %42 = vst.msk [vmem:[#allocation4 + $0x28] sm:$0xff] %vm36_vm0, %v839_v10 }
  0x1a   :  { %43 = vst.msk [vmem:[#allocation4 + $0x30] sm:$0xff] %vm36_vm0, %v839_v10 }
  0x1b   :  { %44 = vst.msk [vmem:[#allocation4 + $0x38] sm:$0xff] %vm36_vm0, %v839_v10 }
  0x1c   :  { %773 = vmatmul.msk.bf16.vlgmr.msrb.gmra.mxu2 %vm36_vm0, %v67_v43  ;;  %771 = vmatmul.msk.bf16.vlgmr.msrb.gmra.mxu0 %vm36_vm0, %v65_v44 }
  0x1f   :  { %774 = vmatmul.msk.bf16.vlgmr.msrb.gmra.mxu3 %vm36_vm0, %v68_v46  ;;  %772 = vmatmul.msk.bf16.vlgmr.msrb.gmra.mxu1 %vm36_vm0, %v66_v47 }
  0x89   :  { %v924_v48 = vpop.f32.mrf.mxu0 }
  0x8a   :  { %v246_v49 = vsel %vm36_vm0, %v924_v48, -inf }
  0x8b   :  { %247 = vmax.xlane.f32.xlu1 %v246_v49 }
  0x8c   :  { %v931_v51 = vpop.f32.mrf.mxu1 }
  0x8d   :  { %v249_v55 = vsel %vm36_vm0, %v931_v51, -inf }
  0x8f   :  { %v935_v52 = vpop.f32.mrf.mxu2 }
  0x90   :  { %v252_v54 = vsel %vm36_vm0, %v935_v52, -inf }
  0x91   :  { %253 = vmax.xlane.f32.xlu0 %v252_v54  ;;  %v103_v56 = vpop.f32.mrf.mxu0 }
  0x92   :  { %v938_v53 = vpop.f32.mrf.mxu3 }
  0x93   :  { %250 = vmax.xlane.f32.xlu1 %v249_v55  ;;  %v255_v58 = vsel %vm36_vm0, %v938_v53, -inf }
  0x94   :  { %v122_v57 = vpop.f32.mrf.mxu1 }
  0x97   :  { %v141_v59 = vpop.f32.mrf.mxu2 }
  0x99   :  { %256 = vmax.xlane.f32.xlu0 %v255_v58  ;;  %v948_v61 = vpop.f32.mrf.mxu0 }
  0x9a   :  { %v160_v60 = vpop.f32.mrf.mxu3  ;;  %v258_v63 = vsel %vm36_vm0, %v948_v61, -inf }
  0x9c   :  { %v950_v62 = vpop.f32.mrf.mxu1 }
  0x9d   :  { %v261_v0 = vsel %vm36_vm0, %v950_v62, -inf }
  0x9e   :  { %262 = vmax.xlane.f32.xlu1 %v261_v0 }
  0x9f   :  { %v956_v1 = vpop.f32.mrf.mxu2 }
  0xa0   :  { %v264_v3 = vsel %vm36_vm0, %v956_v1, -inf }
  0xa1   :  { %265 = vmax.xlane.f32.xlu2 %v264_v3  ;;  %259 = vmax.xlane.f32.xlu0 %v258_v63  ;;  %v179_v4 = vpop.f32.mrf.mxu0  ;;  %v489_v63 = vld [vmem:[%s1147_s2 + $0x10] sm:$0xff] }
  0xa2   :  { %v958_v2 = vpop.f32.mrf.mxu3  ;;  %v497_v0 = vpack.c.bf16 %v489_v63, %v489_v63  ;;  %v488_v4 = vld [vmem:[%s1147_s2 + $0x8] sm:$0xff] }
  0xa3   :  { %v267_v6 = vsel %vm36_vm0, %v958_v2, -inf }
  0xa4   :  { %v198_v5 = vpop.f32.mrf.mxu1  ;;  %v546_v3 = vsel %vm506_vm2, %v497_v0, 0 }
  0xa5   :  { %555 = vmatpush.bf16.msra.mxu2 %v546_v3  ;;  %v496_v5 = vpack.c.bf16 %v488_v4, %v488_v4 }
  0xa7   :  { %v217_v7 = vpop.f32.mrf.mxu2 }
  0xa8   :  { %v493_v7 = vld [vmem:[%s1147_s2 + $0x30] sm:$0xff] }
  0xa9   :  { %268 = vmax.xlane.f32.xlu2 %v267_v6  ;;  %v527_v6 = vsel %vm506_vm2, %v496_v5, 0 }
  0xaa   :  { %v236_v8 = vpop.f32.mrf.mxu3  ;;  %536 = vmatpush.bf16.msra.mxu1 %v527_v6 }
  0xab   :  { %v501_v8 = vpack.c.bf16 %v493_v7, %v493_v7 }
  0xad   :  { %v622_v10 = vsel %vm506_vm2, %v501_v8, 0 }
  0xae   :  { %631 = vmatpush.bf16.msrb.mxu2 %v622_v10 }
  0xfe   :  { %v248_v12 = vpop.xlane.xlu1 %247 }
  0xff   :  { %v270_v13 = vmax.f32 %v238_v11, %v248_v12 }
 0x101   :  { %672 = vst.msk [vmem:[#allocation2] sm:$0xff] %vm19_vm1, %v270_v13  ;;  %304 = vperm.xlu1 %788, %v270_v13   ;;  %v278_v44 = vsub.f32 %v238_v11, %v270_v13  ;;  %v495_v11 = vpack.c.bf16 %v487_v9, %v487_v9 }
 0x103   :  { %v286_v47 = vmul.f32 1.442695, %v278_v44  ;;  %v508_v12 = vsel %vm506_vm2, %v495_v11, 0 }
 0x104   :  { %v254_v15 = vpop.xlane.xlu0 %253  ;;  %517 = vmatpush.bf16.msra.mxu0 %v508_v12 }
 0x105   :  { %v272_v17 = vmax.f32 %v240_v14, %v254_v15 }
 0x106   :  { %v251_v18 = vpop.xlane.xlu1 %250 }
 0x107   :  { %674 = vst.msk [vmem:[#allocation2 + $0x10] sm:$0xff] %vm19_vm1, %v272_v17  ;;  %314 = vperm.xlu2 %786, %v272_v17   ;;  %v271_v19 = vmax.f32 %v239_v16, %v251_v18  ;;  %v280_v20 = vsub.f32 %v240_v14, %v272_v17  ;;  %v490_v17 = vld [vmem:[%s1147_s2 + $0x18] sm:$0xff] }
 0x109   :  { %673 = vst.msk [vmem:[#allocation2 + $0x8] sm:$0xff] %vm19_vm1, %v271_v19  ;;  %v290_v22 = vmul.f32 1.442695, %v280_v20  ;;  %v279_v36 = vsub.f32 %v239_v16, %v271_v19  ;;  %v491_v20 = vld [vmem:[%s1147_s2 + $0x20] sm:$0xff] }
 0x10b   :  { %789 = vpow2.f32 %v290_v22  ;;  %v288_v39 = vmul.f32 1.442695, %v279_v36 }
 0x10c   :  { %v257_v23 = vpop.xlane.xlu0 %256 }
 0x10d   :  { %v273_v24 = vmax.f32 %v241_v21, %v257_v23 }
 0x10f   :  { %675 = vst.msk [vmem:[#allocation2 + $0x18] sm:$0xff] %vm19_vm1, %v273_v24  ;;  %309 = vperm.xlu2 %786, %v271_v19   ;;  %319 = vperm.xlu0 %787, %v273_v24   ;;  %v281_v50 = vsub.f32 %v241_v21, %v273_v24  ;;  %v498_v19 = vpack.c.bf16 %v490_v17, %v490_v17 }
 0x110   :  { %v499_v24 = vpack.c.bf16 %v491_v20, %v491_v20 }
 0x111   :  { %v263_v28 = vpop.xlane.xlu1 %262  ;;  %v985_v34 = vpop.eup %789  ;;  %v292_v55 = vmul.f32 1.442695, %v281_v50  ;;  %v565_v23 = vsel %vm506_vm2, %v498_v19, 0 }
 0x112   :  { %v275_v29 = vmax.f32 %v243_v25, %v263_v28  ;;  %574 = vmatpush.bf16.msra.mxu3 %v565_v23 }
 0x114   :  { %v266_v30 = vpop.xlane.xlu2 %265  ;;  %v260_v31 = vpop.xlane.xlu0 %259  ;;  %677 = vst.msk [vmem:[#allocation2 + $0x28] sm:$0xff] %vm19_vm1, %v275_v29  ;;  %v283_v42 = vsub.f32 %v243_v25, %v275_v29 }
 0x115   :  { %v276_v32 = vmax.f32 %v244_v26, %v266_v30  ;;  %v274_v33 = vmax.f32 %v242_v27, %v260_v31 }
 0x116   :  { %v296_v46 = vmul.f32 1.442695, %v283_v42 }
 0x117   :  { %678 = vst.msk [vmem:[#allocation2 + $0x30] sm:$0xff] %vm19_vm1, %v276_v32  ;;  %334 = vperm.xlu2 %786, %v276_v32   ;;  %443 = vperm.xlu0 %787, %v985_v34   ;;  %v282_v35 = vsub.f32 %v242_v27, %v274_v33  ;;  %v284_v57 = vsub.f32 %v244_v26, %v276_v32  ;;  %v584_v26 = vsel %vm506_vm2, %v499_v24, 0 }
 0x118   :  { %676 = vst.msk [vmem:[#allocation2 + $0x20] sm:$0xff] %vm19_vm1, %v274_v33  ;;  %593 = vmatpush.bf16.msrb.mxu0 %v584_v26 }
 0x119   :  { %v294_v37 = vmul.f32 1.442695, %v282_v35  ;;  %v298_v58 = vmul.f32 1.442695, %v284_v57 }
 0x11b   :  { %791 = vpow2.f32 %v294_v37  ;;  %v494_v37 = vld [vmem:[%s1147_s2 + $0x38] sm:$0xff] }
 0x11c   :  { %v269_v40 = vpop.xlane.xlu2 %268  ;;  %793 = vpow2.f32 %v288_v39  ;;  %v502_v39 = vpack.c.bf16 %v494_v37, %v494_v37 }
 0x11d   :  { %v993_v41 = vmax.f32 %v990_v38, %v269_v40  ;;  %795 = vpow2.f32 %v296_v46 }
 0x11e   :  { %797 = vpow2.f32 %v286_v47 }
 0x11f   :  { %v285_v43 = vsub.f32 %v990_v38, %v993_v41  ;;  %679 = vst.msk [vmem:[#allocation2 + $0x38] sm:$0xff] %vm19_vm1, %v993_v41  ;;  %339 = vperm.xlu1 %788, %v993_v41   ;;  %324 = vperm.xlu2 %786, %v274_v33   ;;  %799 = vpow2.f32 %v292_v55 }
 0x120   :  { %801 = vpow2.f32 %v298_v58 }
 0x121   :  { %v1000_v45 = vpop.eup %791  ;;  %v300_v20 = vmul.f32 1.442695, %v285_v43  ;;  %v367_v43 = vld [vmem:[#allocation3 + $0x8] sm:$0xff] }
 0x122   :  { %453 = vperm.xlu0 %787, %v1000_v45   ;;  %v1003_v49 = vpop.eup %793 }
 0x123   :  { %v1006_v54 = vpop.eup %795 }
 0x124   :  { %v1008_v56 = vpop.eup %797 }
 0x125   :  { %v1012_v59 = vpop.eup %799 }
 0x126   :  { %v1015_v60 = vpop.eup %801 }
 0x127   :  { %329 = vperm.xlu1 %788, %v275_v29   ;;  %438 = vperm.xlu2 %786, %v1003_v49  }
 0x12f   :  { %433 = vperm.xlu1 %788, %v1008_v56   ;;  %458 = vperm.xlu2 %786, %v1006_v54  }
 0x137   :  { %448 = vperm.xlu1 %788, %v1012_v59  }
 0x13f   :  { %463 = vperm.xlu1 %788, %v1015_v60  }
 0x161   :  { %v315_v13 = vpop.permute.xlu2 %314 }
 0x162   :  { %v344_v14 = vsub.f32 %v935_v52, %v315_v13 }
 0x164   :  { %v354_v15 = vmul.f32 1.442695, %v344_v14 }
 0x166   :  { %803 = vpow2.f32 %v354_v15 }
 0x169   :  { %v310_v16 = vpop.permute.xlu2 %309 }
 0x16a   :  { %v343_v18 = vsub.f32 %v931_v51, %v310_v16 }
 0x16c   :  { %v804_v21 = vpop.eup %803  ;;  %v352_v22 = vmul.f32 1.442695, %v343_v18 }
 0x16d   :  { %v481_v52 = vpack.c.bf16 %v804_v21, %v804_v21  ;;  %v388_v25 = vsel %vm36_vm0, %v804_v21, 0.0 }
 0x16e   :  { %805 = vpow2.f32 %v352_v22  ;;  %389 = vadd.xlane.f32.xlu1 %v388_v25 }
 0x16f   :  { %777 = vmatmul.msk.bf16.vlgmr.msra.gmra.mxu2 %vm36_vm0, %v481_v52  ;;  %v368_v52 = vld [vmem:[#allocation3 + $0x10] sm:$0xff] }
 0x170   :  { %v376_v25 = vmul.f32 %v985_v34, %v368_v52  ;;  %v366_v34 = vld [vmem:[#allocation3] sm:$0xff] }
 0x171   :  { %v335_v51 = vpop.permute.xlu2 %334 }
 0x172   :  { %v348_v27 = vsub.f32 %v956_v1, %v335_v51 }
 0x173   :  { %v305_v28 = vpop.permute.xlu1 %304 }
 0x174   :  { %v806_v29 = vpop.eup %805  ;;  %v362_v30 = vmul.f32 1.442695, %v348_v27  ;;  %v342_v31 = vsub.f32 %v924_v48, %v305_v28  ;;  %v641_v48 = vsel %vm506_vm2, %v502_v39, 0  ;;  %v375_v27 = vmul.f32 %v1003_v49, %v367_v43 }
 0x175   :  { %v480_v32 = vpack.c.bf16 %v806_v29, %v806_v29  ;;  %v385_v33 = vsel %vm36_vm0, %v806_v29, 0.0  ;;  %650 = vmatpush.bf16.msrb.mxu3 %v641_v48 }
 0x176   :  { %807 = vpow2.f32 %v362_v30  ;;  %v350_v35 = vmul.f32 1.442695, %v342_v31  ;;  %386 = vadd.xlane.f32.xlu2 %v385_v33  ;;  %v424_v33 = vld [vmem:[#allocation4 + $0x8] sm:$0xff] }
 0x177   :  { %776 = vmatmul.msk.bf16.vlgmr.msra.gmra.mxu1 %vm36_vm0, %v480_v32  ;;  %v425_v32 = vld [vmem:[#allocation4 + $0x10] sm:$0xff] }
 0x178   :  { %809 = vpow2.f32 %v350_v35 }
 0x179   :  { %v325_v36 = vpop.permute.xlu2 %324 }
 0x17a   :  { %v346_v1 = vsub.f32 %v948_v61, %v325_v36  ;;  %v492_v61 = vld [vmem:[%s1147_s2 + $0x28] sm:$0xff] }
 0x17b   :  { %v500_v58 = vpack.c.bf16 %v492_v61, %v492_v61 }
 0x17c   :  { %v808_v40 = vpop.eup %807  ;;  %v358_v42 = vmul.f32 1.442695, %v346_v1  ;;  %v374_v1 = vmul.f32 %v1008_v56, %v366_v34 }
 0x17d   :  { %v485_v44 = vpack.c.bf16 %v808_v40, %v808_v40  ;;  %v603_v3 = vsel %vm506_vm2, %v500_v58, 0  ;;  %v400_v11 = vsel %vm36_vm0, %v808_v40, 0.0 }
 0x17e   :  { %v810_v46 = vpop.eup %809  ;;  %811 = vpow2.f32 %v358_v42  ;;  %612 = vmatpush.bf16.msrb.mxu1 %v603_v3  ;;  %v369_v3 = vld [vmem:[#allocation3 + $0x18] sm:$0xff] }
 0x17f   :  { %v479_v47 = vpack.c.bf16 %v810_v46, %v810_v46  ;;  %781 = vmatmul.msk.bf16.vlgmr.msrb.gmra.mxu2 %vm36_vm0, %v485_v44  ;;  %v382_v50 = vsel %vm36_vm0, %v810_v46, 0.0 }
 0x180   :  { %383 = vadd.xlane.f32.xlu0 %v382_v50 }
 0x181   :  { %775 = vmatmul.msk.bf16.vlgmr.msra.gmra.mxu0 %vm36_vm0, %v479_v47  ;;  %v320_v55 = vpop.permute.xlu0 %319  ;;  %v439_v23 = vpop.permute.xlu2 %438  ;;  %v370_v47 = vld [vmem:[#allocation3 + $0x20] sm:$0xff] }
 0x182   :  { %v345_v57 = vsub.f32 %v938_v53, %v320_v55  ;;  %v472_v39 = vmul.f32 %v439_v23, %v424_v33  ;;  %v423_v55 = vld [vmem:[#allocation4] sm:$0xff]  ;;  %v378_v56 = vmul.f32 %v1000_v45, %v370_v47  ;;  %v373_v23 = vld [vmem:[#allocation3 + $0x38] sm:$0xff] }
 0x184   :  { %v812_v63 = vpop.eup %811  ;;  %v356_v0 = vmul.f32 1.442695, %v345_v57 }
 0x185   :  { %v394_v4 = vsel %vm36_vm0, %v812_v63, 0.0  ;;  %v483_v8 = vpack.c.bf16 %v812_v63, %v812_v63 }
 0x186   :  { %813 = vpow2.f32 %v356_v0 }
 0x188   :  { %395 = vadd.xlane.f32.xlu0 %v394_v4 }
 0x189   :  { %v1083_v26 = vpop.permute.xlu2 %458  ;;  %v444_v41 = vpop.permute.xlu0 %443 }
 0x18a   :  { %v473_v35 = vmul.f32 %v444_v41, %v425_v32 }
 0x18c   :  { %v814_v5 = vpop.eup %813 }
 0x18d   :  { %v482_v6 = vpack.c.bf16 %v814_v5, %v814_v5  ;;  %v391_v7 = vsel %vm36_vm0, %v814_v5, 0.0  ;;  %v429_v5 = vld [vmem:[#allocation4 + $0x30] sm:$0xff] }
 0x18e   :  { %392 = vadd.xlane.f32.xlu2 %v391_v7 }
 0x18f   :  { %778 = vmatmul.msk.bf16.vlgmr.msra.gmra.mxu3 %vm36_vm0, %v482_v6 }
 0x191   :  { %v340_v9 = vpop.permute.xlu1 %339  ;;  %779 = vmatmul.msk.bf16.vlgmr.msrb.gmra.mxu0 %vm36_vm0, %v483_v8  ;;  %v377_v8 = vmul.f32 %v1012_v59, %v369_v3 }
 0x192   :  { %v349_v53 = vsub.f32 %v958_v2, %v340_v9 }
 0x194   :  { %v364_v10 = vmul.f32 1.442695, %v349_v53  ;;  %v1087_v30 = vpop.permute.xlu0 %453 }
 0x196   :  { %815 = vpow2.f32 %v364_v10  ;;  %401 = vadd.xlane.f32.xlu2 %v400_v11 }
 0x199   :  { %v330_v12 = vpop.permute.xlu1 %329 }
 0x19a   :  { %v347_v13 = vsub.f32 %v950_v62, %v330_v12 }
 0x19c   :  { %v816_v14 = vpop.eup %815  ;;  %v360_v15 = vmul.f32 1.442695, %v347_v13  ;;  %v372_v13 = vld [vmem:[#allocation3 + $0x30] sm:$0xff] }
 0x19d   :  { %v486_v16 = vpack.c.bf16 %v816_v14, %v816_v14  ;;  %v403_v17 = vsel %vm36_vm0, %v816_v14, 0.0 }
 0x19e   :  { %817 = vpow2.f32 %v360_v15  ;;  %404 = vadd.xlane.f32.xlu0 %v403_v17  ;;  %v427_v17 = vld [vmem:[#allocation4 + $0x20] sm:$0xff] }
 0x19f   :  { %782 = vmatmul.msk.bf16.vlgmr.msrb.gmra.mxu3 %vm36_vm0, %v486_v16  ;;  %819 = vpow2.f32 %v300_v20  ;;  %v380_v16 = vmul.f32 %v1015_v60, %v372_v13 }
 0x1a1   :  { %v434_v21 = vpop.permute.xlu1 %433 }
 0x1a2   :  { %v471_v0 = vmul.f32 %v434_v21, %v423_v55  ;;  %v475_v21 = vmul.f32 %v1087_v30, %v427_v17  ;;  %v371_v30 = vld [vmem:[#allocation3 + $0x28] sm:$0xff] }
 0x1a4   :  { %v818_v18 = vpop.eup %817 }
 0x1a5   :  { %v484_v19 = vpack.c.bf16 %v818_v18, %v818_v18  ;;  %v397_v2 = vsel %vm36_vm0, %v818_v18, 0.0  ;;  %v1077_v62 = vpop.eup %819 }
 0x1a6   :  { %398 = vadd.xlane.f32.xlu1 %v397_v2 }
 0x1a7   :  { %780 = vmatmul.msk.bf16.vlgmr.msrb.gmra.mxu1 %vm36_vm0, %v484_v19 }
 0x1a9   :  { %v1080_v22 = vpop.permute.xlu1 %448 }
 0x1b1   :  { %v464_v24 = vpop.permute.xlu1 %463 }
 0x1b2   :  { %468 = vperm.xlu0 %787, %v1077_v62   ;;  %v477_v9 = vmul.f32 %v464_v24, %v429_v5  ;;  %v426_v24 = vld [vmem:[#allocation4 + $0x18] sm:$0xff] }
 0x1b3   :  { %v474_v60 = vmul.f32 %v1080_v22, %v426_v24 }
 0x1e1   :  { %v390_v51 = vpop.xlane.xlu1 %389 }
 0x1e2   :  { %v408_v38 = vadd.f32 %v390_v51, %v376_v25  ;;  %v381_v51 = vmul.f32 %v1077_v62, %v373_v23  ;;  %v379_v62 = vmul.f32 %v1006_v54, %v371_v30 }
 0x1e4   :  { %417 = vst.msk [vmem:[#allocation3 + $0x10] sm:$0xff] %vm19_vm1, %v408_v38 }
 0x1e9   :  { %v387_v28 = vpop.xlane.xlu2 %386 }
 0x1ea   :  { %v407_v29 = vadd.f32 %v387_v28, %v375_v27 }
 0x1eb   :  { %v685_v31 = vld [vmem:[#allocation3 + $0x10] sm:$0xff] }
 0x1ec   :  { %416 = vst.msk [vmem:[#allocation3 + $0x8] sm:$0xff] %vm19_vm1, %v407_v29  ;;  %821 = vrcp.f32 %v685_v31 }
 0x1f2   :  { %v822_v36 = vpop.eup %821  ;;  %v557_v37 = vpop.f32.mrf.mxu2 }
 0x1f3   :  { %v658_v40 = vadd.f32 %v557_v37, %v473_v35  ;;  %719 = vperm.xlu0 %787, %v822_v36   ;;  %v384_v49 = vpop.xlane.xlu0 %383  ;;  %v684_v42 = vld [vmem:[#allocation3 + $0x8] sm:$0xff] }
 0x1f4   :  { %v406_v48 = vadd.f32 %v384_v49, %v374_v1  ;;  %v538_v44 = vpop.f32.mrf.mxu1  ;;  %823 = vrcp.f32 %v684_v42  ;;  %v428_v36 = vld [vmem:[#allocation4 + $0x28] sm:$0xff] }
 0x1f5   :  { %666 = vst.msk [vmem:[#allocation4 + $0x10] sm:$0xff] %vm36_vm0, %v658_v40  ;;  %v657_v46 = vadd.f32 %v538_v44, %v472_v39  ;;  %v430_v39 = vld [vmem:[#allocation4 + $0x38] sm:$0xff]  ;;  %v476_v40 = vmul.f32 %v1083_v26, %v428_v36 }
 0x1f6   :  { %415 = vst.msk [vmem:[#allocation3] sm:$0xff] %vm19_vm1, %v406_v48 }
 0x1f7   :  { %665 = vst.msk [vmem:[#allocation4 + $0x8] sm:$0xff] %vm36_vm0, %v657_v46 }
 0x1fa   :  { %v824_v50 = vpop.eup %823  ;;  %v559_v61 = vpop.f32.mrf.mxu2 }
 0x1fb   :  { %714 = vperm.xlu1 %788, %v824_v50   ;;  %v396_v57 = vpop.xlane.xlu0 %395 }
 0x1fc   :  { %v410_v58 = vadd.f32 %v396_v57, %v378_v56  ;;  %v540_v63 = vpop.f32.mrf.mxu1  ;;  %v701_v26 = vld [vmem:[#allocation4 + $0x10] sm:$0xff] }
 0x1fd   :  { %v683_v4 = vld [vmem:[#allocation3] sm:$0xff] }
 0x1fe   :  { %419 = vst.msk [vmem:[#allocation3 + $0x20] sm:$0xff] %vm19_vm1, %v410_v58  ;;  %v519_v6 = vpop.f32.mrf.mxu0  ;;  %825 = vrcp.f32 %v683_v4 }
 0x1ff   :  { %v656_v7 = vadd.f32 %v519_v6, %v471_v0  ;;  %v700_v0 = vld [vmem:[#allocation4 + $0x8] sm:$0xff] }
 0x201   :  { %664 = vst.msk [vmem:[#allocation4] sm:$0xff] %vm36_vm0, %v656_v7  ;;  %v393_v53 = vpop.xlane.xlu2 %392 }
 0x202   :  { %v409_v45 = vadd.f32 %v393_v53, %v377_v8  ;;  %v633_v10 = vpop.f32.mrf.mxu2 }
 0x203   :  { %v662_v11 = vadd.f32 %v633_v10, %v477_v9 }
 0x204   :  { %v826_v12 = vpop.eup %825  ;;  %418 = vst.msk [vmem:[#allocation3 + $0x18] sm:$0xff] %vm19_vm1, %v409_v45 }
 0x205   :  { %670 = vst.msk [vmem:[#allocation4 + $0x30] sm:$0xff] %vm36_vm0, %v662_v11  ;;  %709 = vperm.xlu2 %786, %v826_v12   ;;  %v687_v14 = vld [vmem:[#allocation3 + $0x20] sm:$0xff] }
 0x206   :  { %v521_v15 = vpop.f32.mrf.mxu0  ;;  %827 = vrcp.f32 %v687_v14 }
 0x208   :  { %v699_v56 = vld [vmem:[#allocation4] sm:$0xff] }
 0x209   :  { %v402_v59 = vpop.xlane.xlu2 %401 }
 0x20a   :  { %v412_v18 = vadd.f32 %v402_v59, %v380_v16  ;;  %v635_v19 = vpop.f32.mrf.mxu2 }
 0x20b   :  { %v686_v2 = vld [vmem:[#allocation3 + $0x18] sm:$0xff] }
 0x20c   :  { %v828_v20 = vpop.eup %827  ;;  %421 = vst.msk [vmem:[#allocation3 + $0x30] sm:$0xff] %vm19_vm1, %v412_v18  ;;  %829 = vrcp.f32 %v686_v2  ;;  %v705_v8 = vld [vmem:[#allocation4 + $0x30] sm:$0xff] }
 0x20d   :  { %729 = vperm.xlu1 %788, %v828_v20  }
 0x20e   :  { %v595_v52 = vpop.f32.mrf.mxu0 }
 0x20f   :  { %v660_v25 = vadd.f32 %v595_v52, %v475_v21 }
 0x211   :  { %668 = vst.msk [vmem:[#allocation4 + $0x20] sm:$0xff] %vm36_vm0, %v660_v25  ;;  %v405_v38 = vpop.xlane.xlu0 %404 }
 0x212   :  { %v830_v41 = vpop.eup %829  ;;  %v413_v43 = vadd.f32 %v405_v38, %v381_v51  ;;  %v576_v27 = vpop.f32.mrf.mxu3 }
 0x213   :  { %v659_v28 = vadd.f32 %v576_v27, %v474_v60  ;;  %724 = vperm.xlu2 %786, %v830_v41   ;;  %v689_v29 = vld [vmem:[#allocation3 + $0x30] sm:$0xff] }
 0x214   :  { %422 = vst.msk [vmem:[#allocation3 + $0x38] sm:$0xff] %vm19_vm1, %v413_v43  ;;  %831 = vrcp.f32 %v689_v29 }
 0x215   :  { %667 = vst.msk [vmem:[#allocation4 + $0x18] sm:$0xff] %vm36_vm0, %v659_v28 }
 0x216   :  { %v597_v31 = vpop.f32.mrf.mxu0 }
 0x218   :  { %v703_v10 = vld [vmem:[#allocation4 + $0x20] sm:$0xff] }
 0x219   :  { %v399_v32 = vpop.xlane.xlu1 %398 }
 0x21a   :  { %v832_v22 = vpop.eup %831  ;;  %v411_v34 = vadd.f32 %v399_v32, %v379_v62  ;;  %v578_v33 = vpop.f32.mrf.mxu3 }
 0x21b   :  { %739 = vperm.xlu2 %786, %v832_v22   ;;  %v690_v35 = vld [vmem:[#allocation3 + $0x38] sm:$0xff] }
 0x21c   :  { %420 = vst.msk [vmem:[#allocation3 + $0x28] sm:$0xff] %vm19_vm1, %v411_v34  ;;  %833 = vrcp.f32 %v690_v35  ;;  %v702_v4 = vld [vmem:[#allocation4 + $0x18] sm:$0xff] }
 0x222   :  { %v834_v37 = vpop.eup %833  ;;  %v652_v1 = vpop.f32.mrf.mxu3 }
 0x223   :  { %744 = vperm.xlu1 %788, %v834_v37   ;;  %v688_v49 = vld [vmem:[#allocation3 + $0x28] sm:$0xff] }
 0x224   :  { %v614_v42 = vpop.f32.mrf.mxu1  ;;  %v469_v48 = vpop.permute.xlu0 %468  ;;  %835 = vrcp.f32 %v688_v49 }
 0x225   :  { %v661_v54 = vadd.f32 %v614_v42, %v476_v40  ;;  %v478_v44 = vmul.f32 %v469_v48, %v430_v39 }
 0x227   :  { %669 = vst.msk [vmem:[#allocation4 + $0x28] sm:$0xff] %vm36_vm0, %v661_v54  ;;  %v663_v46 = vadd.f32 %v652_v1, %v478_v44 }
 0x229   :  { %671 = vst.msk [vmem:[#allocation4 + $0x38] sm:$0xff] %vm36_vm0, %v663_v46 }
 0x22a   :  { %v836_v47 = vpop.eup %835  ;;  %v654_v50 = vpop.f32.mrf.mxu3 }
 0x22b   :  { %734 = vperm.xlu0 %787, %v836_v47  }
 0x22c   :  { %v616_v55 = vpop.f32.mrf.mxu1 }
 0x22e   :  { %v704_v15 = vld [vmem:[#allocation4 + $0x28] sm:$0xff] }
 0x230   :  { %v706_v13 = vld [vmem:[#allocation4 + $0x38] sm:$0xff] }
 0x25f   :  { %v710_v61 = vpop.permute.xlu2 %709 }
 0x260   :  { %v747_v57 = vmul.f32 %v710_v61, %v699_v56 }
 0x262   :  { %755 = vst.msk [vmem:[%s1148_s3] sm:$0xff] %vm36_vm0, %v747_v57 }
 0x265   :  { %v720_v58 = vpop.permute.xlu0 %719 }
 0x266   :  { %v749_v63 = vmul.f32 %v720_v58, %v701_v26 }
 0x268   :  { %757 = vst.msk [vmem:[%s1148_s3 + $0x10] sm:$0xff] %vm36_vm0, %v749_v63 }
 0x26d   :  { %v715_v3 = vpop.permute.xlu1 %714  ;;  %v725_v5 = vpop.permute.xlu2 %724 }
 0x26e   :  { %v748_v6 = vmul.f32 %v715_v3, %v700_v0  ;;  %v750_v7 = vmul.f32 %v725_v5, %v702_v4 }
 0x270   :  { %756 = vst.msk [vmem:[%s1148_s3 + $0x8] sm:$0xff] %vm36_vm0, %v748_v6 }
 0x271   :  { %758 = vst.msk [vmem:[%s1148_s3 + $0x18] sm:$0xff] %vm36_vm0, %v750_v7 }
 0x275   :  { %v740_v9 = vpop.permute.xlu2 %739 }
 0x276   :  { %v753_v53 = vmul.f32 %v740_v9, %v705_v8 }
 0x278   :  { %761 = vst.msk [vmem:[%s1148_s3 + $0x30] sm:$0xff] %vm36_vm0, %v753_v53 }
 0x27f   :  { %v730_v45 = vpop.permute.xlu1 %729 }
 0x280   :  { %v751_v11 = vmul.f32 %v730_v45, %v703_v10 }
 0x282   :  { %759 = vst.msk [vmem:[%s1148_s3 + $0x20] sm:$0xff] %vm36_vm0, %v751_v11 }
 0x295   :  { %v745_v12 = vpop.permute.xlu1 %744 }
 0x296   :  { %v754_v14 = vmul.f32 %v745_v12, %v706_v13 }
 0x298   :  { %762 = vst.msk [vmem:[%s1148_s3 + $0x38] sm:$0xff] %vm36_vm0, %v754_v14 }
 0x29d   :  { %v735_v16 = vpop.permute.xlu0 %734 }
 0x29e   :  { %v752_v59 = vmul.f32 %v735_v16, %v704_v15 }
 0x2a0   :  { %760 = vst.msk [vmem:[%s1148_s3 + $0x28] sm:$0xff] %vm36_vm0, %v752_v59 }

</bundles_post_ra>
